<compile_context>
chip_gen: v6e
topology: v6e:2x2x1
jax: 0.10.0
libtpu: 0.0.40
codegen_flags: <defaults>
</compile_context>

<pallas_src>
import functools

import jax
import jax.numpy as jnp
from jax.experimental import pallas as pl
from jax.experimental.pallas import tpu as pltpu

D = 784          # 28 * 28, kept unpadded (block last dim equals the full array dim)
LAT_RAW = 20
LAT_PAD = 128    # latent padded to lane width once at param-prep time (zero pad, exact)


def _round_up(x, m):
    return (x + m - 1) // m * m


# ----------------------------- Pallas kernel --------------------------------
def ae_kernel(x_ref,
              w1_ref, b1_ref, w2_ref, b2_ref, w3_ref, b3_ref,
              w4_ref, b4_ref, w5_ref, b5_ref, w6_ref, b6_ref,
              o_ref):
    def dense(h_bf16, w_ref, b_ref):
        # bf16 x bf16 on the MXU, f32 accumulation; bias add in f32 on the VPU.
        return jnp.dot(h_bf16, w_ref[...],
                       preferred_element_type=jnp.float32) + b_ref[...]

    def relu_bf16(a):
        return jnp.maximum(a, 0.0).astype(jnp.bfloat16)

    h = x_ref[...]                                   # (TB, 784) bf16, straight from HBM
    # encoder
    h = relu_bf16(dense(h, w1_ref, b1_ref))          # (TB, 256)
    h = relu_bf16(dense(h, w2_ref, b2_ref))          # (TB, 64)
    h = relu_bf16(dense(h, w3_ref, b3_ref))          # (TB, 128)  latent (20 padded to 128)
    # decoder
    h = relu_bf16(dense(h, w4_ref, b4_ref))          # (TB, 64)
    h = relu_bf16(dense(h, w5_ref, b5_ref))          # (TB, 256)
    h = dense(h, w6_ref, b6_ref)                     # (TB, 784) f32 pre-activation
    # sigmoid(h) = 0.5*tanh(0.5*h) + 0.5 : a single EUP push per element.
    o_ref[...] = (0.5 * jnp.tanh(0.5 * h) + 0.5).astype(o_ref.dtype)


# --------------------------- one-time param repack ---------------------------
def prepare_params(params):
    """Pad latent dims 20->128 (zeros, exact) and cast weights to bf16, once."""
    row_pad = [0, 0, 0, LAT_PAD - LAT_RAW, 0, 0]
    col_pad = [0, 0, LAT_PAD - LAT_RAW, 0, 0, 0]
    flat = []
    for (w, bias), rp, cp in zip(params, row_pad, col_pad):
        flat.append(jnp.pad(w, ((0, rp), (0, cp))).astype(jnp.bfloat16))
        flat.append(jnp.pad(bias, ((0, 0), (0, cp))).astype(jnp.float32))
    return tuple(flat)


def _choose_tile(b, tb_max):
    """Balanced batch tiles (pad <= 15 rows); >=2 grid steps for larger batches
    so the 'parallel' axis actually shards across both TensorCores on v7x."""
    n = pl.cdiv(b, tb_max)
    if b >= 256:
        n = max(n, 2)
    n = max(n, 1)
    return _round_up(pl.cdiv(b, n), 16)   # multiple of 16: bf16 sublane packing


# ------------------------------ wrapper --------------------------------------
@functools.partial(jax.jit, static_argnames=("tb_max",))
def ae_forward(x_nchw, flat_params, *, tb_max=1024):
    """x_nchw: (B, 1, 28, 28). flat_params: output of prepare_params(). Returns bf16."""
    b = x_nchw.shape[0]
    # Single fused reshape + cast; no column padding of x/out at all.
    x = jnp.reshape(x_nchw, (b, D)).astype(jnp.bfloat16)

    tb = _choose_tile(b, tb_max)
    b_pad = _round_up(b, tb)
    if b_pad != b:
        x = jnp.pad(x, ((0, b_pad - b), (0, 0)))

    grid = (b_pad // tb,)
    io_spec = pl.BlockSpec((tb, D), lambda i: (i, 0))
    # Full-array blocks + constant index_map => weights DMA'd once, VMEM-resident.
    # (pl.Buffered(1) single-buffering would free ~1 MB more — minor, skipped.)
    param_specs = [pl.BlockSpec(a.shape, lambda i: (0, 0)) for a in flat_params]

    out = pl.pallas_call(
        ae_kernel,
        out_shape=jax.ShapeDtypeStruct((b_pad, D), jnp.bfloat16),
        grid=grid,
        in_specs=[io_spec] + param_specs,
        out_specs=io_spec,
        compiler_params=pltpu.CompilerParams(
            dimension_semantics=("parallel",),   # megacore batch sharding on v7x
            vmem_limit_bytes=48 << 20,           # tb<=1024 fits easily; safe on 64 MiB/TC
        ),
    )(x, *flat_params)

    if b_pad != b:
        out = out[:b]
    return jnp.reshape(out, (b, 1, 28, 28))


# --------------------------- parameter init ----------------------------------
def init_params(key):
    """Deterministic init mimicking torch nn.Linear default (uniform +/- 1/sqrt(fan_in))."""
    dims = [(784, 256), (256, 64), (64, 20), (20, 64), (64, 256), (256, 784)]
    params = []
    for fan_in, fan_out in dims:
        key, kw, kb = jax.random.split(key, 3)
        bound = 1.0 / jnp.sqrt(jnp.float32(fan_in))
        w = jax.random.uniform(kw, (fan_in, fan_out), jnp.float32, -bound, bound)
        bias = jax.random.uniform(kb, (1, fan_out), jnp.float32, -bound, bound)
        params.append((w, bias))
    return params


def ae_reference(x_nchw, params):
    b = x_nchw.shape[0]
    h = jnp.reshape(x_nchw, (b, D)).astype(jnp.float32)
    for i, (w, bias) in enumerate(params):
        h = h @ w + bias
        h = jnp.maximum(h, 0.0) if i < 5 else jax.nn.sigmoid(h)
    return jnp.reshape(h, (b, 1, 28, 28))


# ---------------------------------- main --------------------------------------
if __name__ == "__main__":
    key = jax.random.PRNGKey(0)
    key, kx = jax.random.split(key)

    params = init_params(key)
    flat = prepare_params(params)                      # one-time bf16 repack
    x = jax.random.normal(kx, (2, 1, 28, 28), jnp.float32)   # B=2, NCHW

    out = jax.block_until_ready(ae_forward(x, flat))
    ref = jax.block_until_ready(ae_reference(x, params))

    assert out.shape == (2, 1, 28, 28), out.shape
    # bf16 weights/activations/output -> loosened tolerance vs the f32 reference;
    # sigmoid outputs are in [0,1] so bf16 adds at most ~4e-3 absolute error.
    err = float(jnp.max(jnp.abs(out.astype(jnp.float32) - ref)))
    assert err < 2e-2, f"max abs err {err}"
    print("KERNEL_OK")
</pallas_src>

<mosaic_0001>
module attributes {stable_mosaic.version = 11 : i64} {
  func.func @ae_kernel(%arg0: i32, %arg1: memref<16x784xbf16, #tpu.memory_space<vmem>>, %arg2: memref<784x256xbf16, #tpu.memory_space<vmem>>, %arg3: memref<1x256xf32, #tpu.memory_space<vmem>>, %arg4: memref<256x64xbf16, #tpu.memory_space<vmem>>, %arg5: memref<1x64xf32, #tpu.memory_space<vmem>>, %arg6: memref<64x128xbf16, #tpu.memory_space<vmem>>, %arg7: memref<1x128xf32, #tpu.memory_space<vmem>>, %arg8: memref<128x64xbf16, #tpu.memory_space<vmem>>, %arg9: memref<1x64xf32, #tpu.memory_space<vmem>>, %arg10: memref<64x256xbf16, #tpu.memory_space<vmem>>, %arg11: memref<1x256xf32, #tpu.memory_space<vmem>>, %arg12: memref<256x784xbf16, #tpu.memory_space<vmem>>, %arg13: memref<1x784xf32, #tpu.memory_space<vmem>>, %arg14: memref<16x784xbf16, #tpu.memory_space<vmem>>) attributes {dimension_semantics = [#tpu.dimension_semantics<parallel>], iteration_bounds = array<i64: 1>, scalar_prefetch = 0 : i64, scratch_operands = 0 : i64, tpu.core_type = #tpu.core_type<tc>, window_params = [{transform_indices = @transform_0, window_bounds = array<i64: 16, 784>}, {pipeline_mode = #tpu.pipeline_mode<synchronous>, transform_indices = @transform_1, window_bounds = array<i64: 784, 256>}, {pipeline_mode = #tpu.pipeline_mode<synchronous>, transform_indices = @transform_2, window_bounds = array<i64: 1, 256>}, {pipeline_mode = #tpu.pipeline_mode<synchronous>, transform_indices = @transform_3, window_bounds = array<i64: 256, 64>}, {pipeline_mode = #tpu.pipeline_mode<synchronous>, transform_indices = @transform_4, window_bounds = array<i64: 1, 64>}, {pipeline_mode = #tpu.pipeline_mode<synchronous>, transform_indices = @transform_5, window_bounds = array<i64: 64, 128>}, {pipeline_mode = #tpu.pipeline_mode<synchronous>, transform_indices = @transform_6, window_bounds = array<i64: 1, 128>}, {pipeline_mode = #tpu.pipeline_mode<synchronous>, transform_indices = @transform_7, window_bounds = array<i64: 128, 64>}, {pipeline_mode = #tpu.pipeline_mode<synchronous>, transform_indices = @transform_8, window_bounds = array<i64: 1, 64>}, {pipeline_mode = #tpu.pipeline_mode<synchronous>, transform_indices = @transform_9, window_bounds = array<i64: 64, 256>}, {pipeline_mode = #tpu.pipeline_mode<synchronous>, transform_indices = @transform_10, window_bounds = array<i64: 1, 256>}, {pipeline_mode = #tpu.pipeline_mode<synchronous>, transform_indices = @transform_11, window_bounds = array<i64: 256, 784>}, {pipeline_mode = #tpu.pipeline_mode<synchronous>, transform_indices = @transform_12, window_bounds = array<i64: 1, 784>}, {transform_indices = @transform_13, window_bounds = array<i64: 16, 784>}]} {
    %c0 = arith.constant 0 : index
    %c0_0 = arith.constant 0 : index
    %0 = vector.load %arg1[%c0, %c0_0] : memref<16x784xbf16, #tpu.memory_space<vmem>>, vector<16x784xbf16>
    %c0_1 = arith.constant 0 : index
    %c0_2 = arith.constant 0 : index
    %1 = vector.load %arg2[%c0_1, %c0_2] : memref<784x256xbf16, #tpu.memory_space<vmem>>, vector<784x256xbf16>
    %cst = arith.constant dense<0.000000e+00> : vector<16x256xf32>
    %2 = tpu.matmul %0, %1, %cst {dimension_numbers = #tpu.dot_dimension_numbers<[1], [0], [0], [1], [0, 0, 1, 1], [], []>} : vector<16x784xbf16>, vector<784x256xbf16>, vector<16x256xf32> -> vector<16x256xf32>
    %c0_3 = arith.constant 0 : index
    %c0_4 = arith.constant 0 : index
    %3 = vector.load %arg3[%c0_3, %c0_4] : memref<1x256xf32, #tpu.memory_space<vmem>>, vector<1x256xf32>
    %4 = vector.broadcast %3 : vector<1x256xf32> to vector<16x256xf32>
    %5 = arith.addf %2, %4 : vector<16x256xf32>
    %cst_5 = arith.constant 0.000000e+00 : f32
    %6 = vector.broadcast %cst_5 : f32 to vector<16x256xf32>
    %7 = arith.maximumf %5, %6 : vector<16x256xf32>
    %8 = arith.truncf %7 : vector<16x256xf32> to vector<16x256xbf16>
    %c0_6 = arith.constant 0 : index
    %c0_7 = arith.constant 0 : index
    %9 = vector.load %arg4[%c0_6, %c0_7] : memref<256x64xbf16, #tpu.memory_space<vmem>>, vector<256x64xbf16>
    %cst_8 = arith.constant dense<0.000000e+00> : vector<16x64xf32>
    %10 = tpu.matmul %8, %9, %cst_8 {dimension_numbers = #tpu.dot_dimension_numbers<[1], [0], [0], [1], [0, 0, 1, 1], [], []>} : vector<16x256xbf16>, vector<256x64xbf16>, vector<16x64xf32> -> vector<16x64xf32>
    %c0_9 = arith.constant 0 : index
    %c0_10 = arith.constant 0 : index
    %11 = vector.load %arg5[%c0_9, %c0_10] : memref<1x64xf32, #tpu.memory_space<vmem>>, vector<1x64xf32>
    %12 = vector.broadcast %11 : vector<1x64xf32> to vector<16x64xf32>
    %13 = arith.addf %10, %12 : vector<16x64xf32>
    %cst_11 = arith.constant 0.000000e+00 : f32
    %14 = vector.broadcast %cst_11 : f32 to vector<16x64xf32>
    %15 = arith.maximumf %13, %14 : vector<16x64xf32>
    %16 = arith.truncf %15 : vector<16x64xf32> to vector<16x64xbf16>
    %c0_12 = arith.constant 0 : index
    %c0_13 = arith.constant 0 : index
    %17 = vector.load %arg6[%c0_12, %c0_13] : memref<64x128xbf16, #tpu.memory_space<vmem>>, vector<64x128xbf16>
    %cst_14 = arith.constant dense<0.000000e+00> : vector<16x128xf32>
    %18 = tpu.matmul %16, %17, %cst_14 {dimension_numbers = #tpu.dot_dimension_numbers<[1], [0], [0], [1], [0, 0, 1, 1], [], []>} : vector<16x64xbf16>, vector<64x128xbf16>, vector<16x128xf32> -> vector<16x128xf32>
    %c0_15 = arith.constant 0 : index
    %c0_16 = arith.constant 0 : index
    %19 = vector.load %arg7[%c0_15, %c0_16] : memref<1x128xf32, #tpu.memory_space<vmem>>, vector<1x128xf32>
    %20 = vector.broadcast %19 : vector<1x128xf32> to vector<16x128xf32>
    %21 = arith.addf %18, %20 : vector<16x128xf32>
    %cst_17 = arith.constant 0.000000e+00 : f32
    %22 = vector.broadcast %cst_17 : f32 to vector<16x128xf32>
    %23 = arith.maximumf %21, %22 : vector<16x128xf32>
    %24 = arith.truncf %23 : vector<16x128xf32> to vector<16x128xbf16>
    %c0_18 = arith.constant 0 : index
    %c0_19 = arith.constant 0 : index
    %25 = vector.load %arg8[%c0_18, %c0_19] : memref<128x64xbf16, #tpu.memory_space<vmem>>, vector<128x64xbf16>
    %cst_20 = arith.constant dense<0.000000e+00> : vector<16x64xf32>
    %26 = tpu.matmul %24, %25, %cst_20 {dimension_numbers = #tpu.dot_dimension_numbers<[1], [0], [0], [1], [0, 0, 1, 1], [], []>} : vector<16x128xbf16>, vector<128x64xbf16>, vector<16x64xf32> -> vector<16x64xf32>
    %c0_21 = arith.constant 0 : index
    %c0_22 = arith.constant 0 : index
    %27 = vector.load %arg9[%c0_21, %c0_22] : memref<1x64xf32, #tpu.memory_space<vmem>>, vector<1x64xf32>
    %28 = vector.broadcast %27 : vector<1x64xf32> to vector<16x64xf32>
    %29 = arith.addf %26, %28 : vector<16x64xf32>
    %cst_23 = arith.constant 0.000000e+00 : f32
    %30 = vector.broadcast %cst_23 : f32 to vector<16x64xf32>
    %31 = arith.maximumf %29, %30 : vector<16x64xf32>
    %32 = arith.truncf %31 : vector<16x64xf32> to vector<16x64xbf16>
    %c0_24 = arith.constant 0 : index
    %c0_25 = arith.constant 0 : index
    %33 = vector.load %arg10[%c0_24, %c0_25] : memref<64x256xbf16, #tpu.memory_space<vmem>>, vector<64x256xbf16>
    %cst_26 = arith.constant dense<0.000000e+00> : vector<16x256xf32>
    %34 = tpu.matmul %32, %33, %cst_26 {dimension_numbers = #tpu.dot_dimension_numbers<[1], [0], [0], [1], [0, 0, 1, 1], [], []>} : vector<16x64xbf16>, vector<64x256xbf16>, vector<16x256xf32> -> vector<16x256xf32>
    %c0_27 = arith.constant 0 : index
    %c0_28 = arith.constant 0 : index
    %35 = vector.load %arg11[%c0_27, %c0_28] : memref<1x256xf32, #tpu.memory_space<vmem>>, vector<1x256xf32>
    %36 = vector.broadcast %35 : vector<1x256xf32> to vector<16x256xf32>
    %37 = arith.addf %34, %36 : vector<16x256xf32>
    %cst_29 = arith.constant 0.000000e+00 : f32
    %38 = vector.broadcast %cst_29 : f32 to vector<16x256xf32>
    %39 = arith.maximumf %37, %38 : vector<16x256xf32>
    %40 = arith.truncf %39 : vector<16x256xf32> to vector<16x256xbf16>
    %c0_30 = arith.constant 0 : index
    %c0_31 = arith.constant 0 : index
    %41 = vector.load %arg12[%c0_30, %c0_31] : memref<256x784xbf16, #tpu.memory_space<vmem>>, vector<256x784xbf16>
    %cst_32 = arith.constant dense<0.000000e+00> : vector<16x784xf32>
    %42 = tpu.matmul %40, %41, %cst_32 {dimension_numbers = #tpu.dot_dimension_numbers<[1], [0], [0], [1], [0, 0, 1, 1], [], []>} : vector<16x256xbf16>, vector<256x784xbf16>, vector<16x784xf32> -> vector<16x784xf32>
    %c0_33 = arith.constant 0 : index
    %c0_34 = arith.constant 0 : index
    %43 = vector.load %arg13[%c0_33, %c0_34] : memref<1x784xf32, #tpu.memory_space<vmem>>, vector<1x784xf32>
    %44 = vector.broadcast %43 : vector<1x784xf32> to vector<16x784xf32>
    %45 = arith.addf %42, %44 : vector<16x784xf32>
    %cst_35 = arith.constant 5.000000e-01 : f32
    %46 = vector.broadcast %cst_35 : f32 to vector<16x784xf32>
    %47 = arith.mulf %46, %45 : vector<16x784xf32>
    %48 = math.tanh %47 : vector<16x784xf32>
    %cst_36 = arith.constant 5.000000e-01 : f32
    %49 = vector.broadcast %cst_36 : f32 to vector<16x784xf32>
    %50 = arith.mulf %49, %48 : vector<16x784xf32>
    %cst_37 = arith.constant 5.000000e-01 : f32
    %51 = vector.broadcast %cst_37 : f32 to vector<16x784xf32>
    %52 = arith.addf %50, %51 : vector<16x784xf32>
    %53 = arith.truncf %52 : vector<16x784xf32> to vector<16x784xbf16>
    %c0_38 = arith.constant 0 : index
    %c0_39 = arith.constant 0 : index
    %54 = vector.load %arg14[%c0_38, %c0_39] : memref<16x784xbf16, #tpu.memory_space<vmem>>, vector<16x784xbf16>
    tpu.vector_store %arg14[%c0_38, %c0_39], %53 {strides = array<i32>} : memref<16x784xbf16, #tpu.memory_space<vmem>>, vector<16x784xbf16>,
    return
  }
  func.func @transform_0(%arg0: i32) -> (i32, i32) {
    %c0_i32 = arith.constant 0 : i32
    %c0_i32_0 = arith.constant 0 : i32
    return %arg0, %c0_i32 : i32, i32
  }
  func.func @transform_1(%arg0: i32) -> (i32, i32) {
    %c0_i32 = arith.constant 0 : i32
    %c0_i32_0 = arith.constant 0 : i32
    %c0_i32_1 = arith.constant 0 : i32
    return %c0_i32, %c0_i32_0 : i32, i32
  }
  func.func @transform_2(%arg0: i32) -> (i32, i32) {
    %c0_i32 = arith.constant 0 : i32
    %c0_i32_0 = arith.constant 0 : i32
    %c0_i32_1 = arith.constant 0 : i32
    return %c0_i32, %c0_i32_0 : i32, i32
  }
  func.func @transform_3(%arg0: i32) -> (i32, i32) {
    %c0_i32 = arith.constant 0 : i32
    %c0_i32_0 = arith.constant 0 : i32
    %c0_i32_1 = arith.constant 0 : i32
    return %c0_i32, %c0_i32_0 : i32, i32
  }
  func.func @transform_4(%arg0: i32) -> (i32, i32) {
    %c0_i32 = arith.constant 0 : i32
    %c0_i32_0 = arith.constant 0 : i32
    %c0_i32_1 = arith.constant 0 : i32
    return %c0_i32, %c0_i32_0 : i32, i32
  }
  func.func @transform_5(%arg0: i32) -> (i32, i32) {
    %c0_i32 = arith.constant 0 : i32
    %c0_i32_0 = arith.constant 0 : i32
    %c0_i32_1 = arith.constant 0 : i32
    return %c0_i32, %c0_i32_0 : i32, i32
  }
  func.func @transform_6(%arg0: i32) -> (i32, i32) {
    %c0_i32 = arith.constant 0 : i32
    %c0_i32_0 = arith.constant 0 : i32
    %c0_i32_1 = arith.constant 0 : i32
    return %c0_i32, %c0_i32_0 : i32, i32
  }
  func.func @transform_7(%arg0: i32) -> (i32, i32) {
    %c0_i32 = arith.constant 0 : i32
    %c0_i32_0 = arith.constant 0 : i32
    %c0_i32_1 = arith.constant 0 : i32
    return %c0_i32, %c0_i32_0 : i32, i32
  }
  func.func @transform_8(%arg0: i32) -> (i32, i32) {
    %c0_i32 = arith.constant 0 : i32
    %c0_i32_0 = arith.constant 0 : i32
    %c0_i32_1 = arith.constant 0 : i32
    return %c0_i32, %c0_i32_0 : i32, i32
  }
  func.func @transform_9(%arg0: i32) -> (i32, i32) {
    %c0_i32 = arith.constant 0 : i32
    %c0_i32_0 = arith.constant 0 : i32
    %c0_i32_1 = arith.constant 0 : i32
    return %c0_i32, %c0_i32_0 : i32, i32
  }
  func.func @transform_10(%arg0: i32) -> (i32, i32) {
    %c0_i32 = arith.constant 0 : i32
    %c0_i32_0 = arith.constant 0 : i32
    %c0_i32_1 = arith.constant 0 : i32
    return %c0_i32, %c0_i32_0 : i32, i32
  }
  func.func @transform_11(%arg0: i32) -> (i32, i32) {
    %c0_i32 = arith.constant 0 : i32
    %c0_i32_0 = arith.constant 0 : i32
    %c0_i32_1 = arith.constant 0 : i32
    return %c0_i32, %c0_i32_0 : i32, i32
  }
  func.func @transform_12(%arg0: i32) -> (i32, i32) {
    %c0_i32 = arith.constant 0 : i32
    %c0_i32_0 = arith.constant 0 : i32
    %c0_i32_1 = arith.constant 0 : i32
    return %c0_i32, %c0_i32_0 : i32, i32
  }
  func.func @transform_13(%arg0: i32) -> (i32, i32) {
    %c0_i32 = arith.constant 0 : i32
    %c0_i32_0 = arith.constant 0 : i32
    return %arg0, %c0_i32 : i32, i32
  }
}

</mosaic_0001>

<bundles_post_ra>
// kernel: ae_forward.1
= control target key start
LH: loop header
LB: loop body
LE: loop exit
PB: predicated region body
PF: predicated region fallthrough
CT: control target
= control target key end

     0   :  { %vm688_vm0 = vcmask 130048   ;;  %vm3142_vm1 = vmmov 0   ;;  %vm1088_vm2 = vcmask 523264   ;;  %vm2377_vm3 = vcmask 125952   ;;  %s4068_s1 = inlined_call_operand.vmem [shape: bf16[784,256], index: 1, kind: input, shape index: {}]   ;;  %s4069_s0 = inlined_call_operand.vmem [shape: bf16[16,784], index: 0, kind: input, shape index: {}]   ;;  %s4070_s3 = inlined_call_operand.vmem [shape: bf16[256,64], index: 3, kind: input, shape index: {}]   ;;  %s4071_s2 = inlined_call_operand.vmem [shape: f32[1,256], index: 2, kind: input, shape index: {}]   ;;  %s4072_s5 = inlined_call_operand.vmem [shape: bf16[64,128], index: 5, kind: input, shape index: {}]   ;;  %s4073_s7 = inlined_call_operand.vmem [shape: bf16[128,64], index: 7, kind: input, shape index: {}]   ;;  %s4074_s4 = inlined_call_operand.vmem [shape: f32[1,64], index: 4, kind: input, shape index: {}]   ;;  %s4075_s9 = inlined_call_operand.vmem [shape: bf16[64,256], index: 9, kind: input, shape index: {}]   ;;  %s4076_s6 = inlined_call_operand.vmem [shape: f32[1,128], index: 6, kind: input, shape index: {}]   ;;  %s4077_s11 = inlined_call_operand.vmem [shape: bf16[256,784], index: 11, kind: input, shape index: {}]   ;;  %s4078_s8 = inlined_call_operand.vmem [shape: f32[1,64], index: 8, kind: input, shape index: {}]   ;;  %s4079_s10 = inlined_call_operand.vmem [shape: f32[1,256], index: 10, kind: input, shape index: {}]   ;;  %s4080_s12 = inlined_call_operand.vmem [shape: f32[1,784], index: 12, kind: input, shape index: {}]   ;;  %s4081_s13 = inlined_call_operand.vmem [shape: bf16[16,784], index: 13, kind: output, shape index: {}]  }
   0x1   :  { %v2755_v0 = vld [vmem:[%s4068_s1 + $0x74] ss:$8 sps:$4 sm:$0xff]   ;;  %v2757_v1 = vld [vmem:[%s4068_s1 + $0x70] ss:$8 sps:$4 sm:$0xff]   ;;  %v2761_v4 = vld [vmem:[%s4068_s1 + $0x64] ss:$8 sps:$4 sm:$0xff]  }
   0x2   :  { %692 = vmatprep.subr.bf16.mxu0 %v2755_v0  ;;  %v2758_v2 = vld [vmem:[%s4068_s1 + $0x174] ss:$8 sps:$4 sm:$0xff]   ;;  %v2760_v3 = vld [vmem:[%s4068_s1 + $0x170] ss:$8 sps:$4 sm:$0xff]   ;;  %v2763_v5 = vld [vmem:[%s4068_s1 + $0x60] ss:$8 sps:$4 sm:$0xff]  }
   0x3   :  { %693 = vmatpush1.bf16.msra.mxu0 %v2757_v1  ;;  %735 = vmatprep.subr.bf16.mxu1 %v2758_v2  ;;  %v2764_v6 = vld [vmem:[%s4068_s1 + $0x164] ss:$8 sps:$4 sm:$0xff]   ;;  %v2766_v7 = vld [vmem:[%s4068_s1 + $0x160] ss:$8 sps:$4 sm:$0xff]   ;;  %v2767_v8 = vld [vmem:[%s4068_s1 + $0x54] ss:$8 sps:$4 sm:$0xff]  }
   0x4   :  { %736 = vmatpush1.bf16.msra.mxu1 %v2760_v3  ;;  %694 = vmatprep.subr.bf16.mxu0 %v2761_v4  ;;  %v2769_v9 = vld [vmem:[%s4068_s1 + $0x50] ss:$8 sps:$4 sm:$0xff]   ;;  %v2770_v10 = vld [vmem:[%s4068_s1 + $0x154] ss:$8 sps:$4 sm:$0xff]   ;;  %v2773_v11 = vld [vmem:[%s4068_s1 + $0x44] ss:$8 sps:$4 sm:$0xff]  }
   0x5   :  { %737 = vmatprep.subr.bf16.mxu1 %v2764_v6  ;;  %v2772_v12 = vld [vmem:[%s4068_s1 + $0x150] ss:$8 sps:$4 sm:$0xff]   ;;  %v2776_v13 = vld [vmem:[%s4068_s1 + $0x144] ss:$8 sps:$4 sm:$0xff]   ;;  %v2775_v14 = vld [vmem:[%s4068_s1 + $0x40] ss:$8 sps:$4 sm:$0xff]  }
   0x6   :  { %v2779_v15 = vld [vmem:[%s4068_s1 + $0x34] ss:$8 sps:$4 sm:$0xff]   ;;  %v2778_v16 = vld [vmem:[%s4068_s1 + $0x140] ss:$8 sps:$4 sm:$0xff]   ;;  %v2781_v18 = vld [vmem:[%s4068_s1 + $0x30] ss:$8 sps:$4 sm:$0xff]  }
   0x7   :  { %695 = vmatpush1.bf16.msra.mxu0 %v2763_v5  ;;  %v2782_v17 = vld [vmem:[%s4068_s1 + $0x134] ss:$8 sps:$4 sm:$0xff]   ;;  %v2785_v19 = vld [vmem:[%s4068_s1 + $0x24] ss:$8 sps:$4 sm:$0xff]   ;;  %v2784_v20 = vld [vmem:[%s4068_s1 + $0x130] ss:$8 sps:$4 sm:$0xff]  }
   0x8   :  { %696 = vmatprep.subr.bf16.mxu0 %v2767_v8  ;;  %738 = vmatpush1.bf16.msra.mxu1 %v2766_v7  ;;  %v2788_v21 = vld [vmem:[%s4068_s1 + $0x124] ss:$8 sps:$4 sm:$0xff]   ;;  %v2787_v22 = vld [vmem:[%s4068_s1 + $0x20] ss:$8 sps:$4 sm:$0xff]   ;;  %v2791_v23 = vld [vmem:[%s4068_s1 + $0x14] ss:$8 sps:$4 sm:$0xff]  }
   0x9   :  { %739 = vmatprep.subr.bf16.mxu1 %v2770_v10  ;;  %v2790_v24 = vld [vmem:[%s4068_s1 + $0x120] ss:$8 sps:$4 sm:$0xff]   ;;  %v2794_v25 = vld [vmem:[%s4068_s1 + $0x114] ss:$8 sps:$4 sm:$0xff]   ;;  %v2793_v26 = vld [vmem:[%s4068_s1 + $0x10] ss:$8 sps:$4 sm:$0xff]  }
   0xa   :  { %v2797_v27 = vld [vmem:[%s4068_s1 + $0x4] ss:$8 sps:$4 sm:$0xff]   ;;  %v2796_v28 = vld [vmem:[%s4068_s1 + $0x110] ss:$8 sps:$4 sm:$0xff]   ;;  %v2799_v30 = vld [vmem:[%s4068_s1] ss:$8 sps:$4 sm:$0xff]  }
   0xb   :  { %697 = vmatpush1.bf16.msra.mxu0 %v2769_v9  ;;  %v2800_v29 = vld [vmem:[%s4068_s1 + $0x104] ss:$8 sps:$4 sm:$0xff]   ;;  %v2803_v31 = vld [vmem:[%s4068_s1 + $0xf4] ss:$8 sps:$4 sm:$0xff]   ;;  %v2802_v32 = vld [vmem:[%s4068_s1 + $0x100] ss:$8 sps:$4 sm:$0xff]  }
   0xc   :  { %698 = vmatprep.subr.bf16.mxu0 %v2773_v11  ;;  %740 = vmatpush1.bf16.msra.mxu1 %v2772_v12  ;;  %v2806_v33 = vld [vmem:[%s4068_s1 + $0x1f4] ss:$8 sps:$4 sm:$0xff]   ;;  %v2805_v34 = vld [vmem:[%s4068_s1 + $0xf0] ss:$8 sps:$4 sm:$0xff]   ;;  %v2809_v35 = vld [vmem:[%s4068_s1 + $0xe4] ss:$8 sps:$4 sm:$0xff]  }
   0xd   :  { %741 = vmatprep.subr.bf16.mxu1 %v2776_v13  ;;  %v2808_v36 = vld [vmem:[%s4068_s1 + $0x1f0] ss:$8 sps:$4 sm:$0xff]   ;;  %v2812_v37 = vld [vmem:[%s4068_s1 + $0x1e4] ss:$8 sps:$4 sm:$0xff]   ;;  %v2811_v38 = vld [vmem:[%s4068_s1 + $0xe0] ss:$8 sps:$4 sm:$0xff]  }
   0xe   :  { %v2815_v39 = vld [vmem:[%s4068_s1 + $0xd4] ss:$8 sps:$4 sm:$0xff]   ;;  %v2814_v40 = vld [vmem:[%s4068_s1 + $0x1e0] ss:$8 sps:$4 sm:$0xff]   ;;  %v2817_v42 = vld [vmem:[%s4068_s1 + $0xd0] ss:$8 sps:$4 sm:$0xff]  }
   0xf   :  { %699 = vmatpush1.bf16.msra.mxu0 %v2775_v14  ;;  %v2818_v41 = vld [vmem:[%s4068_s1 + $0x1d4] ss:$8 sps:$4 sm:$0xff]   ;;  %v2821_v43 = vld [vmem:[%s4068_s1 + $0xc4] ss:$8 sps:$4 sm:$0xff]   ;;  %v2820_v44 = vld [vmem:[%s4068_s1 + $0x1d0] ss:$8 sps:$4 sm:$0xff]  }
  0x10   :  { %700 = vmatprep.subr.bf16.mxu0 %v2779_v15  ;;  %742 = vmatpush1.bf16.msra.mxu1 %v2778_v16  ;;  %v2824_v45 = vld [vmem:[%s4068_s1 + $0x1c4] ss:$8 sps:$4 sm:$0xff]   ;;  %v2823_v46 = vld [vmem:[%s4068_s1 + $0xc0] ss:$8 sps:$4 sm:$0xff]   ;;  %v2827_v48 = vld [vmem:[%s4068_s1 + $0xb4] ss:$8 sps:$4 sm:$0xff]  }
  0x11   :  { %743 = vmatprep.subr.bf16.mxu1 %v2782_v17  ;;  %v2852_v47 = vld [vmem:[%s4069_s0 + $0x4] ss:$28 sps:$4 sm:$0xff]   ;;  %v2830_v50 = vld [vmem:[%s4068_s1 + $0x1b4] ss:$8 sps:$4 sm:$0xff]   ;;  %v2859_v51 = vld [vmem:[%s4069_s0 + $0xc] ss:$28 sps:$4 sm:$0xff]  }
  0x12   :  { %v2826_v49 = vld [vmem:[%s4068_s1 + $0x1c0] ss:$8 sps:$4 sm:$0xff]   ;;  %724 = vmatprep.mubr.bf16.mxu0 %v2852_v47  ;;  %v2829_v52 = vld [vmem:[%s4068_s1 + $0xb0] ss:$8 sps:$4 sm:$0xff]   ;;  %v2833_v53 = vld [vmem:[%s4068_s1 + $0xa4] ss:$8 sps:$4 sm:$0xff]   ;;  %767 = vmatprep.mubr.bf16.mxu1 %v2859_v51 }
  0x13   :  { %701 = vmatpush1.bf16.msra.mxu0 %v2781_v18  ;;  %v2832_v54 = vld [vmem:[%s4068_s1 + $0x1b0] ss:$8 sps:$4 sm:$0xff]   ;;  %v2836_v55 = vld [vmem:[%s4068_s1 + $0x1a4] ss:$8 sps:$4 sm:$0xff]   ;;  %v2835_v56 = vld [vmem:[%s4068_s1 + $0xa0] ss:$8 sps:$4 sm:$0xff]  }
  0x14   :  { %702 = vmatprep.subr.bf16.mxu0 %v2785_v19  ;;  %744 = vmatpush1.bf16.msra.mxu1 %v2784_v20  ;;  %v2839_v57 = vld [vmem:[%s4068_s1 + $0x94] ss:$8 sps:$4 sm:$0xff]   ;;  %v2838_v58 = vld [vmem:[%s4068_s1 + $0x1a0] ss:$8 sps:$4 sm:$0xff]   ;;  %v2841_v60 = vld [vmem:[%s4068_s1 + $0x90] ss:$8 sps:$4 sm:$0xff]  }
  0x15   :  { %745 = vmatprep.subr.bf16.mxu1 %v2788_v21  ;;  %v2842_v59 = vld [vmem:[%s4068_s1 + $0x194] ss:$8 sps:$4 sm:$0xff]   ;;  %v2845_v61 = vld [vmem:[%s4068_s1 + $0x84] ss:$8 sps:$4 sm:$0xff]   ;;  %v2844_v62 = vld [vmem:[%s4068_s1 + $0x190] ss:$8 sps:$4 sm:$0xff]  }
  0x16   :  { %v2848_v63 = vld [vmem:[%s4068_s1 + $0x184] ss:$8 sps:$4 sm:$0xff]   ;;  %v2847_v0 = vld [vmem:[%s4068_s1 + $0x80] ss:$8 sps:$4 sm:$0xff]   ;;  %v2856_v1 = vld [vmem:[%s4068_s1 + $0x274] ss:$8 sps:$4 sm:$0xff]  }
  0x17   :  { %703 = vmatpush1.bf16.msra.mxu0 %v2787_v22  ;;  %v2853_v2 = vld [vmem:[%s4068_s1 + $0x180] ss:$8 sps:$4 sm:$0xff]   ;;  %v2854_v4 = vld [vmem:[%s4068_s1 + $0x270] ss:$8 sps:$4 sm:$0xff]   ;;  %v2862_v6 = vld [vmem:[%s4068_s1 + $0x264] ss:$8 sps:$4 sm:$0xff]  }
  0x18   :  { %704 = vmatprep.subr.bf16.mxu0 %v2791_v23  ;;  %746 = vmatpush1.bf16.msra.mxu1 %v2790_v24  ;;  %v2850_v3 = vld [vmem:[%s4069_s0] ss:$28 sps:$4 sm:$0xff]   ;;  %v2857_v5 = vld [vmem:[%s4069_s0 + $0x8] ss:$28 sps:$4 sm:$0xff]   ;;  %v3140_v11 = vmov 0  }
  0x19   :  { %747 = vmatprep.subr.bf16.mxu1 %v2794_v25  ;;  %v2902_v7 = vld [vmem:[%s4068_s1 + $0x300] ss:$8 sps:$4 sm:$0xff]   ;;  %v2904_v8 = vld [vmem:[%s4068_s1 + $0x304] ss:$8 sps:$4 sm:$0xff]   ;;  %v2865_v10 = vld [vmem:[%s4068_s1 + $0x254] ss:$8 sps:$4 sm:$0xff]  }
  0x1a   :  { %v2860_v9 = vld [vmem:[%s4068_s1 + $0x260] ss:$8 sps:$4 sm:$0xff]   ;;  %v2911_v12 = vld [vmem:[%s4069_s0 + $0x14] ss:$28 sps:$4 sm:$0xff]   ;;  %v2868_v14 = vld [vmem:[%s4068_s1 + $0x244] ss:$8 sps:$4 sm:$0xff]  }
  0x1b   :  { %705 = vmatpush1.bf16.msra.mxu0 %v2793_v26  ;;  %v2863_v13 = vld [vmem:[%s4068_s1 + $0x250] ss:$8 sps:$4 sm:$0xff]   ;;  %v2866_v16 = vld [vmem:[%s4068_s1 + $0x240] ss:$8 sps:$4 sm:$0xff]   ;;  %v2871_v17 = vld [vmem:[%s4068_s1 + $0x234] ss:$8 sps:$4 sm:$0xff]  }
  0x1c   :  { %706 = vmatprep.subr.bf16.mxu0 %v2797_v27  ;;  %748 = vmatpush1.bf16.msra.mxu1 %v2796_v28  ;;  %v2908_v15 = vld [vmem:[%s4069_s0 + $0x18] ss:$28 sps:$4 sm:$0xff]   ;;  %v2874_v19 = vld [vmem:[%s4068_s1 + $0x224] ss:$8 sps:$4 sm:$0xff]   ;;  %v2872_v20 = vld [vmem:[%s4068_s1 + $0x220] ss:$8 sps:$4 sm:$0xff]  }
  0x1d   :  { %749 = vmatprep.subr.bf16.mxu1 %v2800_v29  ;;  %v2869_v18 = vld [vmem:[%s4068_s1 + $0x230] ss:$8 sps:$4 sm:$0xff]   ;;  %v2877_v21 = vld [vmem:[%s4068_s1 + $0x214] ss:$8 sps:$4 sm:$0xff]   ;;  %v2880_v23 = vld [vmem:[%s4068_s1 + $0x204] ss:$8 sps:$4 sm:$0xff]  }
  0x1e   :  { %v2875_v22 = vld [vmem:[%s4068_s1 + $0x210] ss:$8 sps:$4 sm:$0xff]   ;;  %v2878_v24 = vld [vmem:[%s4068_s1 + $0x200] ss:$8 sps:$4 sm:$0xff]   ;;  %v2883_v25 = vld [vmem:[%s4068_s1 + $0x2f4] ss:$8 sps:$4 sm:$0xff]  }
  0x1f   :  { %707 = vmatpush1.bf16.msra.mxu0 %v2799_v30  ;;  %v2881_v26 = vld [vmem:[%s4068_s1 + $0x2f0] ss:$8 sps:$4 sm:$0xff]   ;;  %v2886_v27 = vld [vmem:[%s4068_s1 + $0x2e4] ss:$8 sps:$4 sm:$0xff]   ;;  %v2884_v28 = vld [vmem:[%s4068_s1 + $0x2e0] ss:$8 sps:$4 sm:$0xff]  }
  0x20   :  { %708 = vmatprep.subr.bf16.mxu0 %v2803_v31  ;;  %750 = vmatpush1.bf16.msra.mxu1 %v2802_v32  ;;  %v2889_v29 = vld [vmem:[%s4068_s1 + $0x2d4] ss:$8 sps:$4 sm:$0xff]   ;;  %v2887_v30 = vld [vmem:[%s4068_s1 + $0x2d0] ss:$8 sps:$4 sm:$0xff]   ;;  %v2892_v31 = vld [vmem:[%s4068_s1 + $0x2c4] ss:$8 sps:$4 sm:$0xff]  }
  0x21   :  { %751 = vmatprep.subr.bf16.mxu1 %v2806_v33  ;;  %v2890_v32 = vld [vmem:[%s4068_s1 + $0x2c0] ss:$8 sps:$4 sm:$0xff]   ;;  %v2895_v33 = vld [vmem:[%s4068_s1 + $0x2b4] ss:$8 sps:$4 sm:$0xff]  }
  0x22   :  { %v2917_v47 = vld [vmem:[%s4070_s3 + $0x28] sm:$0xff]   ;;  %v2921_v51 = vld [vmem:[%s4070_s3 + $0x18] sm:$0xff]  }
  0x23   :  { %709 = vmatpush2.bf16.msra.mxu0 %v2805_v34  ;;  %v2893_v34 = vld [vmem:[%s4068_s1 + $0x2b0] ss:$8 sps:$4 sm:$0xff]  }
  0x24   :  { %710 = vmatprep.subr.bf16.mxu0 %v2809_v35  ;;  %752 = vmatpush2.bf16.msra.mxu1 %v2808_v36  ;;  %v2898_v35 = vld [vmem:[%s4068_s1 + $0x2a4] ss:$8 sps:$4 sm:$0xff]   ;;  %v2896_v36 = vld [vmem:[%s4068_s1 + $0x2a0] ss:$8 sps:$4 sm:$0xff]  }
  0x25   :  { %753 = vmatprep.subr.bf16.mxu1 %v2812_v37  ;;  %v2901_v37 = vld [vmem:[%s4068_s1 + $0x294] ss:$8 sps:$4 sm:$0xff]  }
  0x27   :  { %711 = vmatpush2.bf16.msra.mxu0 %v2811_v38  ;;  %v2899_v38 = vld [vmem:[%s4068_s1 + $0x290] ss:$8 sps:$4 sm:$0xff]  }
  0x28   :  { %712 = vmatprep.subr.bf16.mxu0 %v2815_v39  ;;  %754 = vmatpush2.bf16.msra.mxu1 %v2814_v40  ;;  %v2907_v39 = vld [vmem:[%s4068_s1 + $0x284] ss:$8 sps:$4 sm:$0xff]   ;;  %v2905_v40 = vld [vmem:[%s4068_s1 + $0x280] ss:$8 sps:$4 sm:$0xff]  }
  0x29   :  { %755 = vmatprep.subr.bf16.mxu1 %v2818_v41  ;;  %v2909_v41 = vld [vmem:[%s4069_s0 + $0x10] ss:$28 sps:$4 sm:$0xff]  }
  0x2b   :  { %713 = vmatpush2.bf16.msra.mxu0 %v2817_v42  ;;  %v2912_v42 = vld [vmem:[%s4070_s3 + $0x78] sm:$0xff]  }
  0x2c   :  { %714 = vmatprep.subr.bf16.mxu0 %v2821_v43  ;;  %756 = vmatpush2.bf16.msra.mxu1 %v2820_v44  ;;  %v2913_v43 = vld [vmem:[%s4070_s3 + $0x38] sm:$0xff]   ;;  %v2914_v44 = vld [vmem:[%s4070_s3 + $0x70] sm:$0xff]  }
  0x2d   :  { %757 = vmatprep.subr.bf16.mxu1 %v2824_v45  ;;  %v2915_v45 = vld [vmem:[%s4070_s3 + $0x30] sm:$0xff]  }
  0x2f   :  { %715 = vmatpush2.bf16.msra.mxu0 %v2823_v46  ;;  %v2916_v46 = vld [vmem:[%s4070_s3 + $0x68] sm:$0xff]  }
  0x30   :  { %716 = vmatprep.subr.bf16.mxu0 %v2827_v48  ;;  %758 = vmatpush2.bf16.msra.mxu1 %v2826_v49  ;;  %v2918_v48 = vld [vmem:[%s4070_s3 + $0x60] sm:$0xff]  }
  0x31   :  { %759 = vmatprep.subr.bf16.mxu1 %v2830_v50  ;;  %v2919_v49 = vld [vmem:[%s4070_s3 + $0x20] sm:$0xff]   ;;  %v2920_v50 = vld [vmem:[%s4070_s3 + $0x58] sm:$0xff]  }
  0x33   :  { %717 = vmatpush2.bf16.msra.mxu0 %v2829_v52  ;;  %v2922_v52 = vld [vmem:[%s4070_s3 + $0x50] sm:$0xff]  }
  0x34   :  { %718 = vmatprep.subr.bf16.mxu0 %v2833_v53  ;;  %760 = vmatpush2.bf16.msra.mxu1 %v2832_v54  ;;  %v2923_v53 = vld [vmem:[%s4070_s3 + $0x10] sm:$0xff]   ;;  %v2924_v54 = vld [vmem:[%s4070_s3 + $0x48] sm:$0xff]  }
  0x35   :  { %761 = vmatprep.subr.bf16.mxu1 %v2836_v55  ;;  %v2925_v55 = vld [vmem:[%s4070_s3 + $0x8] sm:$0xff]  }
  0x37   :  { %719 = vmatpush2.bf16.msra.mxu0 %v2835_v56  ;;  %v2926_v56 = vld [vmem:[%s4070_s3 + $0x40] sm:$0xff]  }
  0x38   :  { %720 = vmatprep.subr.bf16.mxu0 %v2839_v57  ;;  %762 = vmatpush2.bf16.msra.mxu1 %v2838_v58  ;;  %v2927_v57 = vld [vmem:[%s4070_s3] sm:$0xff]   ;;  %v3141_v58 = vmov 0.0  }
  0x39   :  { %763 = vmatprep.subr.bf16.mxu1 %v2842_v59  ;;  %v153_v59 = vlaneseq }
  0x3b   :  { %721 = vmatpush2.bf16.msra.mxu0 %v2841_v60 }
  0x3c   :  { %722 = vmatprep.subr.bf16.mxu0 %v2845_v61  ;;  %764 = vmatpush2.bf16.msra.mxu1 %v2844_v62  ;;  %v3578_v61 = vshrl.u32 %v153_v59, 7  ;;  %v2933_v59 = vld [vmem:[%s4073_s7 + $0x30] sm:$0xff]  }
  0x3d   :  { %765 = vmatprep.subr.bf16.mxu1 %v2848_v63 }
  0x3f   :  { %723 = vmatpush2.bf16.msra.mxu0 %v2847_v0  ;;  %v3581_v0 = vsub.s32 1, %v3578_v61 }
  0x40   :  { %778 = vmatprep.subr.bf16.mxu0 %v2856_v1  ;;  %766 = vmatpush2.bf16.msra.mxu1 %v2853_v2  ;;  %v151_v1 = vld [vmem:[%s4071_s2] sm:$0x3]  ;;  %v3587_v2 = vsub.s32 0, %v3578_v61 }
  0x41   :  { %835 = vmatprep.subr.bf16.mxu1 %v2904_v8 }
  0x42   :  { %725 = vmatmul.mubr.bf16.vlgmr.msra.gmra.mxu0 %v2850_v3 }
  0x43   :  { %779 = vmatpush1.bf16.msra.mxu0 %v2854_v4  ;;  %768 = vmatmul.mubr.bf16.vlgmr.msra.gmra.mxu1 %v2857_v5  ;;  %v160_v5 = vrot.slane %v151_v1, %v3581_v0 }
  0x44   :  { %780 = vmatprep.subr.bf16.mxu0 %v2862_v6  ;;  %853 = vmatprep.mubr.bf16.mxu1 %v3140_v11  ;;  %v156_v6 = vrot.slane %v151_v1, %v3587_v2  ;;  %v2937_v1 = vld [vmem:[%s4073_s7 + $0x10] sm:$0xff]  }
  0x45   :  { %836 = vmatpush1.bf16.msra.mxu1 %v2902_v7  ;;  %810 = vmatprep.mubr.bf16.mxu0 %v2911_v12 }
  0x46   :  { %2662 = vmatprep.subr.bf16.mxu1 %v2912_v42  ;;  %v2929_v42 = vld [vmem:[%s4072_s5 + $0x10] sm:$0xff]  }
  0x47   :  { %781 = vmatpush1.bf16.msra.mxu0 %v2860_v9 }
  0x48   :  { %782 = vmatprep.subr.bf16.mxu0 %v2865_v10 }
  0x4b   :  { %783 = vmatpush1.bf16.msra.mxu0 %v2863_v13  ;;  %2492 = vmatmul.mubr.msk.bf16.vlgmr.msra.gmra.mxu1 %vm688_vm0, %v2908_v15 }
  0x4c   :  { %784 = vmatprep.subr.bf16.mxu0 %v2868_v14  ;;  %2663 = vmatpush3.bf16.msra.mxu1 %v2913_v43  ;;  %v2930_v43 = vld [vmem:[%s4072_s5 + $0x8] sm:$0xff]  }
  0x4d   :  { %2664 = vmatprep.subr.bf16.mxu1 %v2914_v44  ;;  %v2931_v44 = vld [vmem:[%s4072_s5] sm:$0xff]  }
  0x4f   :  { %785 = vmatpush1.bf16.msra.mxu0 %v2866_v16 }
  0x50   :  { %786 = vmatprep.subr.bf16.mxu0 %v2871_v17  ;;  %2665 = vmatpush3.bf16.msra.mxu1 %v2915_v45 }
  0x51   :  { %2666 = vmatprep.subr.bf16.mxu1 %v2916_v46 }
  0x53   :  { %787 = vmatpush1.bf16.msra.mxu0 %v2869_v18 }
  0x54   :  { %788 = vmatprep.subr.bf16.mxu0 %v2874_v19  ;;  %2667 = vmatpush3.bf16.msra.mxu1 %v2917_v47 }
  0x55   :  { %2668 = vmatprep.subr.bf16.mxu1 %v2918_v48  ;;  %v2493_v48 = vld [vmem:[%s4074_s4] ss:$0 sm:$0xff] }
  0x57   :  { %789 = vmatpush1.bf16.msra.mxu0 %v2872_v20 }
  0x58   :  { %790 = vmatprep.subr.bf16.mxu0 %v2877_v21  ;;  %2669 = vmatpush3.bf16.msra.mxu1 %v2919_v49 }
  0x59   :  { %2670 = vmatprep.subr.bf16.mxu1 %v2920_v50 }
  0x5b   :  { %791 = vmatpush1.bf16.msra.mxu0 %v2875_v22 }
  0x5c   :  { %792 = vmatprep.subr.bf16.mxu0 %v2880_v23  ;;  %2671 = vmatpush3.bf16.msra.mxu1 %v2921_v51 }
  0x5d   :  { %2672 = vmatprep.subr.bf16.mxu1 %v2922_v52 }
  0x5f   :  { %793 = vmatpush1.bf16.msra.mxu0 %v2878_v24 }
  0x60   :  { %794 = vmatprep.subr.bf16.mxu0 %v2883_v25  ;;  %2673 = vmatpush3.bf16.msra.mxu1 %v2923_v53 }
  0x61   :  { %2674 = vmatprep.subr.bf16.mxu1 %v2924_v54 }
  0x63   :  { %795 = vmatpush2.bf16.msra.mxu0 %v2881_v26 }
  0x64   :  { %796 = vmatprep.subr.bf16.mxu0 %v2886_v27  ;;  %2675 = vmatpush3.bf16.msra.mxu1 %v2925_v55 }
  0x65   :  { %2676 = vmatprep.subr.bf16.mxu1 %v2926_v56  ;;  %v2932_v56 = vld [vmem:[%s4073_s7 + $0x38] sm:$0xff]  }
  0x67   :  { %797 = vmatpush2.bf16.msra.mxu0 %v2884_v28 }
  0x68   :  { %798 = vmatprep.subr.bf16.mxu0 %v2889_v29  ;;  %2677 = vmatpush3.bf16.msra.mxu1 %v2927_v57 }
  0x69   :  { %2720 = vmatprep.subr.bf16.mxu1 %v3141_v58 }
  0x6b   :  { %799 = vmatpush2.bf16.msra.mxu0 %v2887_v30 }
  0x6c   :  { %800 = vmatprep.subr.bf16.mxu0 %v2892_v31 }
  0x6f   :  { %801 = vmatpush2.bf16.msra.mxu0 %v2890_v32 }
  0x70   :  { %802 = vmatprep.subr.bf16.mxu0 %v2895_v33 }
  0x73   :  { %803 = vmatpush2.bf16.msra.mxu0 %v2893_v34 }
  0x74   :  { %804 = vmatprep.subr.bf16.mxu0 %v2898_v35 }
  0x77   :  { %805 = vmatpush2.bf16.msra.mxu0 %v2896_v36 }
  0x78   :  { %806 = vmatprep.subr.bf16.mxu0 %v2901_v37 }
  0x7b   :  { %807 = vmatpush2.bf16.msra.mxu0 %v2899_v38 }
  0x7c   :  { %808 = vmatprep.subr.bf16.mxu0 %v2907_v39 }
  0x7f   :  { %809 = vmatpush2.bf16.msra.mxu0 %v2905_v40 }
  0x82   :  { %811 = vmatmul.mubr.bf16.vlgmr.msra.gmra.mxu0 %v2909_v41  ;;  %v2928_v41 = vld [vmem:[%s4072_s5 + $0x18] sm:$0xff]  }
 0x102   :  { %v726_v62 = vpop.f32.mrf.mxu0 }
 0x103   :  { %v769_v60 = vpop.f32.mrf.mxu1  ;;  %v727_v12 = vadd.f32 %v726_v62, %v156_v6  ;;  %v2935_v62 = vld [vmem:[%s4073_s7 + $0x20] sm:$0xff]  }
 0x104   :  { %v728_v3 = vpop.f32.mrf.mxu0 }
 0x105   :  { %v771_v63 = vpop.f32.mrf.mxu1  ;;  %v729_v10 = vadd.f32 %v728_v3, %v160_v5  ;;  %v770_v19 = vadd.f32 %v769_v60, %v727_v12  ;;  %v2934_v60 = vld [vmem:[%s4073_s7 + $0x28] sm:$0xff]  }
 0x106   :  { %v730_v7 = vpop.f32.mrf.mxu0  ;;  %v2938_v3 = vld [vmem:[%s4073_s7 + $0x8] sm:$0xff]  }
 0x107   :  { %v773_v4 = vpop.f32.mrf.mxu1  ;;  %v731_v14 = vadd.f32 %v730_v7, %v156_v6  ;;  %v772_v17 = vadd.f32 %v771_v63, %v729_v10  ;;  %v2936_v63 = vld [vmem:[%s4073_s7 + $0x18] sm:$0xff]   ;;  %v2510_v6 = vld [vmem:[%s4076_s6] ss:$0 sm:$0xff] }
 0x108   :  { %v732_v13 = vpop.f32.mrf.mxu0 }
 0x109   :  { %v775_v8 = vpop.f32.mrf.mxu1  ;;  %v733_v18 = vadd.f32 %v732_v13, %v160_v5  ;;  %v774_v21 = vadd.f32 %v773_v4, %v731_v14  ;;  %v2939_v4 = vld [vmem:[%s4073_s7] sm:$0xff]   ;;  %v2942_v5 = vld [vmem:[%s4075_s9 + $0x34] ss:$8 sps:$4 sm:$0xff]  }
 0x10b   :  { %v855_v9 = vpop.f32.mrf.mxu1  ;;  %v776_v26 = vadd.f32 %v775_v8, %v733_v18  ;;  %v2943_v18 = vld [vmem:[%s4075_s9 + $0x20] ss:$8 sps:$4 sm:$0xff]  }
 0x10d   :  { %v857_v15 = vpop.f32.mrf.mxu1 }
 0x10f   :  { %v859_v24 = vpop.f32.mrf.mxu1 }
 0x111   :  { %v861_v33 = vpop.f32.mrf.mxu1 }
 0x142   :  { %v812_v16 = vpop.f32.mrf.mxu0 }
 0x143   :  { %v813_v23 = vadd.f32 %v812_v16, %v770_v19  ;;  %v2948_v19 = vld [vmem:[%s4075_s9 + $0x14] ss:$8 sps:$4 sm:$0xff]  }
 0x144   :  { %v814_v20 = vpop.f32.mrf.mxu0 }
 0x145   :  { %v815_v22 = vadd.f32 %v814_v20, %v772_v17  ;;  %v856_v32 = vadd.f32 %v855_v9, %v813_v23  ;;  %v2945_v17 = vld [vmem:[%s4075_s9 + $0x24] ss:$8 sps:$4 sm:$0xff]   ;;  %v2946_v20 = vld [vmem:[%s4075_s9 + $0x10] ss:$8 sps:$4 sm:$0xff]  }
 0x146   :  { %v816_v25 = vpop.f32.mrf.mxu0  ;;  %v2954_v23 = vld [vmem:[%s4077_s11 + $0x18c] ss:$28 sps:$4 sm:$0xff]  }
 0x147   :  { %v817_v27 = vadd.f32 %v816_v25, %v774_v21  ;;  %v858_v29 = vadd.f32 %v857_v15, %v815_v22  ;;  %v864_v38 = vmax.f32 %v856_v32, 0.0  ;;  %v2940_v15 = vld [vmem:[%s4075_s9 + $0x30] ss:$8 sps:$4 sm:$0xff]   ;;  %v2951_v21 = vld [vmem:[%s4075_s9 + $0x4] ss:$8 sps:$4 sm:$0xff]   ;;  %2104 = vmatprep.subr.bf16.mxu0 %v2954_v23 }
 0x148   :  { %v818_v28 = vpop.f32.mrf.mxu0  ;;  %v2952_v22 = vld [vmem:[%s4077_s11 + $0x188] ss:$28 sps:$4 sm:$0xff]   ;;  %v2960_v25 = vld [vmem:[%s4077_s11 + $0x154] ss:$28 sps:$4 sm:$0xff]  }
 0x149   :  { %v860_v30 = vadd.f32 %v859_v24, %v817_v27  ;;  %v819_v31 = vadd.f32 %v818_v28, %v776_v26  ;;  %v865_v36 = vmax.f32 %v858_v29, 0.0  ;;  %v2957_v24 = vld [vmem:[%s4077_s11 + $0x194] ss:$28 sps:$4 sm:$0xff]   ;;  %2105 = vmatpush1.bf16.msra.mxu0 %v2952_v22  ;;  %v2966_v27 = vld [vmem:[%s4077_s11 + $0x11c] ss:$28 sps:$4 sm:$0xff]  }
 0x14a   :  { %v2958_v26 = vld [vmem:[%s4077_s11 + $0x150] ss:$28 sps:$4 sm:$0xff]   ;;  %2106 = vmatprep.subr.bf16.mxu0 %v2960_v25  ;;  %v2964_v28 = vld [vmem:[%s4077_s11 + $0x118] ss:$28 sps:$4 sm:$0xff]   ;;  %v2972_v29 = vld [vmem:[%s4077_s11 + $0xe4] ss:$28 sps:$4 sm:$0xff]  }
 0x14b   :  { %v862_v34 = vadd.f32 %v861_v33, %v819_v31  ;;  %v866_v35 = vmax.f32 %v860_v30, 0.0  ;;  %v2970_v30 = vld [vmem:[%s4077_s11 + $0xe0] ss:$28 sps:$4 sm:$0xff]   ;;  %v2978_v31 = vld [vmem:[%s4077_s11 + $0xac] ss:$28 sps:$4 sm:$0xff]  }
 0x14c   :  { %v2976_v32 = vld [vmem:[%s4077_s11 + $0xa8] ss:$28 sps:$4 sm:$0xff]   ;;  %v2984_v33 = vld [vmem:[%s4077_s11 + $0x74] ss:$28 sps:$4 sm:$0xff]  }
 0x14d   :  { %v867_v37 = vmax.f32 %v862_v34, 0.0  ;;  %v868_v40 = vpack.c.bf16 %v866_v35, %v864_v38  ;;  %2107 = vmatpush1.bf16.msra.mxu0 %v2958_v26  ;;  %v2982_v34 = vld [vmem:[%s4077_s11 + $0x70] ss:$28 sps:$4 sm:$0xff]   ;;  %v2990_v35 = vld [vmem:[%s4077_s11 + $0x3c] ss:$28 sps:$4 sm:$0xff]  }
 0x14e   :  { %2108 = vmatprep.subr.bf16.mxu0 %v2966_v27  ;;  %v2994_v38 = vld [vmem:[%s4077_s11] ss:$28 sps:$4 sm:$0xff]   ;;  %v3027_v22 = vld [vmem:[%s4077_s11 + $0x270] ss:$28 sps:$4 sm:$0xff]   ;;  %v3033_v26 = vld [vmem:[%s4077_s11 + $0x238] ss:$28 sps:$4 sm:$0xff]  }
 0x14f   :  { %v869_v39 = vpack.c.bf16 %v867_v37, %v865_v36  ;;  %v2988_v36 = vld [vmem:[%s4077_s11 + $0x38] ss:$28 sps:$4 sm:$0xff]   ;;  %v2996_v37 = vld [vmem:[%s4077_s11 + $0x4] ss:$28 sps:$4 sm:$0xff]   ;;  %v3030_v25 = vld [vmem:[%s4077_s11 + $0x230] ss:$28 sps:$4 sm:$0xff]  }
 0x150   :  { %v3032_v23 = vld [vmem:[%s4077_s11 + $0x234] ss:$28 sps:$4 sm:$0xff]   ;;  %v3038_v27 = vld [vmem:[%s4077_s11 + $0x1fc] ss:$28 sps:$4 sm:$0xff]  }
 0x151   :  { %1037 = vmatprep.mubr.bf16.mxu1 %v869_v39  ;;  %2109 = vmatpush1.bf16.msra.mxu0 %v2964_v28  ;;  %v3002_v39 = vld [vmem:[%s4077_s11 + $0x34c] ss:$28 sps:$4 sm:$0xff]   ;;  %v3041_v28 = vld [vmem:[%s4077_s11 + $0x204] ss:$28 sps:$4 sm:$0xff]  }
 0x152   :  { %1038 = vmatmul.mubr.bf16.vlgmr.msra.gmra.mxu1 %v868_v40  ;;  %2110 = vmatprep.subr.bf16.mxu0 %v2972_v29  ;;  %v3000_v40 = vld [vmem:[%s4077_s11 + $0x348] ss:$28 sps:$4 sm:$0xff]   ;;  %v3036_v29 = vld [vmem:[%s4077_s11 + $0x1f8] ss:$28 sps:$4 sm:$0xff]  }
 0x153   :  { %2721 = vmatpush3.bf16.msra.mxu1 %v2928_v41  ;;  %2728 = vmatprep.mubr.msk.bf16.mxu1 %vm3142_vm1, %v3141_v58  ;;  %v3008_v41 = vld [vmem:[%s4077_s11 + $0x314] ss:$28 sps:$4 sm:$0xff]  }
 0x154   :  { %2722 = vmatprep.subr.bf16.mxu1 %v3141_v58 }
 0x155   :  { %2111 = vmatpush1.bf16.msra.mxu0 %v2970_v30  ;;  %v3039_v30 = vld [vmem:[%s4077_s11 + $0x200] ss:$28 sps:$4 sm:$0xff]  }
 0x156   :  { %2112 = vmatprep.subr.bf16.mxu0 %v2978_v31  ;;  %v3044_v31 = vld [vmem:[%s4077_s11 + $0x1c4] ss:$28 sps:$4 sm:$0xff]  }
 0x157   :  { %2723 = vmatpush3.bf16.msra.mxu1 %v2929_v42  ;;  %v3006_v42 = vld [vmem:[%s4077_s11 + $0x310] ss:$28 sps:$4 sm:$0xff]  }
 0x158   :  { %2724 = vmatprep.subr.bf16.mxu1 %v3141_v58 }
 0x159   :  { %2113 = vmatpush1.bf16.msra.mxu0 %v2976_v32  ;;  %v3047_v32 = vld [vmem:[%s4077_s11 + $0x1cc] ss:$28 sps:$4 sm:$0xff]  }
 0x15a   :  { %2114 = vmatprep.subr.bf16.mxu0 %v2984_v33  ;;  %v3042_v33 = vld [vmem:[%s4077_s11 + $0x1c0] ss:$28 sps:$4 sm:$0xff]  }
 0x15b   :  { %2725 = vmatpush3.bf16.msra.mxu1 %v2930_v43  ;;  %v3014_v43 = vld [vmem:[%s4077_s11 + $0x2dc] ss:$28 sps:$4 sm:$0xff]  }
 0x15c   :  { %2726 = vmatprep.subr.bf16.mxu1 %v3141_v58 }
 0x15d   :  { %2115 = vmatpush1.bf16.msra.mxu0 %v2982_v34  ;;  %v3045_v34 = vld [vmem:[%s4077_s11 + $0x1c8] ss:$28 sps:$4 sm:$0xff]  }
 0x15e   :  { %2116 = vmatprep.subr.bf16.mxu0 %v2990_v35  ;;  %v3050_v35 = vld [vmem:[%s4077_s11 + $0x19c] ss:$28 sps:$4 sm:$0xff]  }
 0x15f   :  { %2727 = vmatpush3.bf16.msra.mxu1 %v2931_v44  ;;  %v3012_v44 = vld [vmem:[%s4077_s11 + $0x2d8] ss:$28 sps:$4 sm:$0xff]  }
 0x160   :  { %2732 = vmatprep.subr.bf16.mxu1 %v3141_v58 }
 0x161   :  { %2117 = vmatpush1.bf16.msra.mxu0 %v2988_v36  ;;  %v3051_v36 = vld [vmem:[%s4077_s11 + $0x360] ss:$28 sps:$4 sm:$0xff]  }
 0x162   :  { %2118 = vmatprep.subr.bf16.mxu0 %v2996_v37  ;;  %v1259_v37 = vld [vmem:[%s4079_s10] sm:$0x3] }
 0x165   :  { %2119 = vmatpush1.bf16.msra.mxu0 %v2994_v38 }
 0x166   :  { %2120 = vmatprep.subr.bf16.mxu0 %v3002_v39  ;;  %v1268_v39 = vrot.slane %v1259_v37, %v3581_v0 }
 0x169   :  { %2121 = vmatpush2.bf16.msra.mxu0 %v3000_v40  ;;  %v1264_v40 = vrot.slane %v1259_v37, %v3587_v2  ;;  %v3111_v37 = vld [vmem:[%s4077_s11 + $0x1d4] ss:$28 sps:$4 sm:$0xff]  }
 0x16a   :  { %2122 = vmatprep.subr.bf16.mxu0 %v3008_v41 }
 0x16d   :  { %2123 = vmatpush2.bf16.msra.mxu0 %v3006_v42 }
 0x16e   :  { %2124 = vmatprep.subr.bf16.mxu0 %v3014_v43 }
 0x171   :  { %2125 = vmatpush2.bf16.msra.mxu0 %v3012_v44 }
 0x212   :  { %v2678_v45 = vpop.f32.mrf.mxu1 }
 0x214   :  { %v2679_v46 = vpop.f32.mrf.mxu1 }
 0x215   :  { %v2680_v47 = vadd.f32 %v2679_v46, %v2678_v45  ;;  %v3020_v45 = vld [vmem:[%s4077_s11 + $0x2a4] ss:$28 sps:$4 sm:$0xff]  }
 0x216   :  { %v2681_v49 = vpop.f32.mrf.mxu1  ;;  %v3018_v46 = vld [vmem:[%s4077_s11 + $0x2a0] ss:$28 sps:$4 sm:$0xff]   ;;  %2126 = vmatprep.subr.bf16.mxu0 %v3020_v45 }
 0x217   :  { %v1040_v51 = vadd.f32 %v2680_v47, %v2493_v48  ;;  %v3026_v47 = vld [vmem:[%s4077_s11 + $0x26c] ss:$28 sps:$4 sm:$0xff]   ;;  %2127 = vmatpush2.bf16.msra.mxu0 %v3018_v46 }
 0x218   :  { %v2682_v50 = vpop.f32.mrf.mxu1  ;;  %2128 = vmatprep.subr.bf16.mxu0 %v3026_v47 }
 0x219   :  { %v2683_v52 = vadd.f32 %v2682_v50, %v2681_v49  ;;  %v1046_v54 = vmax.f32 %v1040_v51, 0.0  ;;  %v2516_v49 = vld [vmem:[%s4078_s8] ss:$0 sm:$0xff] }
 0x21b   :  { %v1043_v53 = vadd.f32 %v2683_v52, %v2493_v48  ;;  %v3024_v48 = vld [vmem:[%s4077_s11 + $0x268] ss:$28 sps:$4 sm:$0xff]  }
 0x21c   :  { %2129 = vmatpush2.bf16.msra.mxu0 %v3024_v48 }
 0x21d   :  { %v1047_v55 = vmax.f32 %v1043_v53, 0.0  ;;  %2130 = vmatprep.subr.bf16.mxu0 %v3032_v23  ;;  %v3090_v23 = vld [vmem:[%s4077_s11 + $0x35c] ss:$28 sps:$4 sm:$0xff]  }
 0x21f   :  { %v1048_v57 = vpack.c.bf16 %v1047_v55, %v1046_v54 }
 0x220   :  { %2131 = vmatpush2.bf16.msra.mxu0 %v3030_v25  ;;  %v3093_v25 = vld [vmem:[%s4077_s11 + $0x324] ss:$28 sps:$4 sm:$0xff]  }
 0x221   :  { %2729 = vmatmul.mubr.msk.bf16.vlgmr.msra.gmra.mxu1 %vm1088_vm2, %v1048_v57  ;;  %2132 = vmatprep.subr.bf16.mxu0 %v3038_v27  ;;  %v3096_v27 = vld [vmem:[%s4077_s11 + $0x2ec] ss:$28 sps:$4 sm:$0xff]  }
 0x222   :  { %2733 = vmatpush3.bf16.msra.mxu1 %v2932_v56  ;;  %2748 = vmatprep.mubr.msk.bf16.mxu1 %vm3142_vm1, %v3141_v58 }
 0x223   :  { %2734 = vmatprep.subr.bf16.mxu1 %v3141_v58 }
 0x224   :  { %2133 = vmatpush2.bf16.msra.mxu0 %v3036_v29  ;;  %v3099_v29 = vld [vmem:[%s4077_s11 + $0x2b4] ss:$28 sps:$4 sm:$0xff]  }
 0x225   :  { %2134 = vmatprep.subr.bf16.mxu0 %v3044_v31  ;;  %v3102_v31 = vld [vmem:[%s4077_s11 + $0x27c] ss:$28 sps:$4 sm:$0xff]  }
 0x226   :  { %2735 = vmatpush3.bf16.msra.mxu1 %v2933_v59  ;;  %v2955_v59 = vld [vmem:[%s4077_s11 + $0x190] ss:$28 sps:$4 sm:$0xff]  }
 0x227   :  { %2736 = vmatprep.subr.bf16.mxu1 %v3141_v58 }
 0x228   :  { %2135 = vmatpush2.bf16.msra.mxu0 %v3042_v33  ;;  %v3105_v33 = vld [vmem:[%s4077_s11 + $0x244] ss:$28 sps:$4 sm:$0xff]  }
 0x229   :  { %2190 = vmatprep.subr.bf16.mxu0 %v3050_v35  ;;  %v3108_v35 = vld [vmem:[%s4077_s11 + $0x20c] ss:$28 sps:$4 sm:$0xff]  }
 0x22a   :  { %2737 = vmatpush3.bf16.msra.mxu1 %v2934_v60 }
 0x22b   :  { %2738 = vmatprep.subr.bf16.mxu1 %v3141_v58 }
 0x22e   :  { %2739 = vmatpush3.bf16.msra.mxu1 %v2935_v62  ;;  %v2963_v62 = vld [vmem:[%s4077_s11 + $0x15c] ss:$28 sps:$4 sm:$0xff]  }
 0x22f   :  { %2740 = vmatprep.subr.bf16.mxu1 %v3141_v58 }
 0x232   :  { %2741 = vmatpush3.bf16.msra.mxu1 %v2936_v63  ;;  %v2961_v63 = vld [vmem:[%s4077_s11 + $0x158] ss:$28 sps:$4 sm:$0xff]  }
 0x233   :  { %2742 = vmatprep.subr.bf16.mxu1 %v3141_v58 }
 0x236   :  { %2743 = vmatpush3.bf16.msra.mxu1 %v2937_v1  ;;  %v2969_v1 = vld [vmem:[%s4077_s11 + $0x124] ss:$28 sps:$4 sm:$0xff]  }
 0x237   :  { %2744 = vmatprep.subr.bf16.mxu1 %v3141_v58 }
 0x23a   :  { %2745 = vmatpush3.bf16.msra.mxu1 %v2938_v3  ;;  %v2967_v3 = vld [vmem:[%s4077_s11 + $0x120] ss:$28 sps:$4 sm:$0xff]  }
 0x23b   :  { %2746 = vmatprep.subr.bf16.mxu1 %v3141_v58 }
 0x23e   :  { %2747 = vmatpush3.bf16.msra.mxu1 %v2939_v4  ;;  %v2975_v4 = vld [vmem:[%s4077_s11 + $0xec] ss:$28 sps:$4 sm:$0xff]  }
 0x23f   :  { %1322 = vmatprep.subr.bf16.mxu1 %v2942_v5  ;;  %v2973_v5 = vld [vmem:[%s4077_s11 + $0xe8] ss:$28 sps:$4 sm:$0xff]  }
 0x2e1   :  { %v1126_v7 = vpop.f32.mrf.mxu1 }
 0x2e2   :  { %v1127_v9 = vadd.f32 %v2510_v6, %v1126_v7  ;;  %v2979_v7 = vld [vmem:[%s4077_s11 + $0xb0] ss:$28 sps:$4 sm:$0xff]  }
 0x2e3   :  { %v2730_v8 = vpop.f32.mrf.mxu1 }
 0x2e4   :  { %v1133_v13 = vmax.f32 %v1127_v9, 0.0  ;;  %v2987_v8 = vld [vmem:[%s4077_s11 + $0x7c] ss:$28 sps:$4 sm:$0xff]  }
 0x2e5   :  { %v1129_v10 = vpop.f32.mrf.mxu1  ;;  %v2985_v9 = vld [vmem:[%s4077_s11 + $0x78] ss:$28 sps:$4 sm:$0xff]  }
 0x2e6   :  { %v1130_v12 = vadd.f32 %v2510_v6, %v1129_v10  ;;  %v2981_v6 = vld [vmem:[%s4077_s11 + $0xb4] ss:$28 sps:$4 sm:$0xff]   ;;  %v2993_v10 = vld [vmem:[%s4077_s11 + $0x44] ss:$28 sps:$4 sm:$0xff]  }
 0x2e7   :  { %v2731_v58 = vpop.f32.mrf.mxu1 }
 0x2e8   :  { %v1134_v14 = vmax.f32 %v1130_v12, 0.0  ;;  %v2991_v12 = vld [vmem:[%s4077_s11 + $0x40] ss:$28 sps:$4 sm:$0xff]   ;;  %v2999_v58 = vld [vmem:[%s4077_s11 + $0xc] ss:$28 sps:$4 sm:$0xff]  }
 0x2ea   :  { %v1135_v16 = vpack.c.bf16 %v1134_v14, %v1133_v13  ;;  %v2997_v13 = vld [vmem:[%s4077_s11 + $0x8] ss:$28 sps:$4 sm:$0xff]   ;;  %v3005_v14 = vld [vmem:[%s4077_s11 + $0x354] ss:$28 sps:$4 sm:$0xff]  }
 0x2ec   :  { %2749 = vmatmul.mubr.bf16.vlgmr.msra.gmra.mxu1 %v1135_v16  ;;  %v3011_v16 = vld [vmem:[%s4077_s11 + $0x31c] ss:$28 sps:$4 sm:$0xff]  }
 0x2ed   :  { %1323 = vmatpush1.bf16.msra.mxu1 %v2940_v15  ;;  %1346 = vmatprep.mubr.bf16.mxu1 %v3140_v11  ;;  %v2949_v11 = vld [vmem:[%s4075_s9] ss:$8 sps:$4 sm:$0xff]   ;;  %v3003_v15 = vld [vmem:[%s4077_s11 + $0x350] ss:$28 sps:$4 sm:$0xff]  }
 0x2ee   :  { %1324 = vmatprep.subr.bf16.mxu1 %v2945_v17  ;;  %v3009_v17 = vld [vmem:[%s4077_s11 + $0x318] ss:$28 sps:$4 sm:$0xff]  }
 0x2f1   :  { %1325 = vmatpush1.bf16.msra.mxu1 %v2943_v18  ;;  %v3017_v18 = vld [vmem:[%s4077_s11 + $0x2e4] ss:$28 sps:$4 sm:$0xff]  }
 0x2f2   :  { %1326 = vmatprep.subr.bf16.mxu1 %v2948_v19  ;;  %v3015_v19 = vld [vmem:[%s4077_s11 + $0x2e0] ss:$28 sps:$4 sm:$0xff]  }
 0x2f5   :  { %1327 = vmatpush1.bf16.msra.mxu1 %v2946_v20  ;;  %v3023_v20 = vld [vmem:[%s4077_s11 + $0x2ac] ss:$28 sps:$4 sm:$0xff]  }
 0x2f6   :  { %1328 = vmatprep.subr.bf16.mxu1 %v2951_v21  ;;  %v3021_v21 = vld [vmem:[%s4077_s11 + $0x2a8] ss:$28 sps:$4 sm:$0xff]  }
 0x2f9   :  { %1329 = vmatpush1.bf16.msra.mxu1 %v2949_v11  ;;  %v3029_v11 = vld [vmem:[%s4077_s11 + $0x274] ss:$28 sps:$4 sm:$0xff]  }
 0x2fa   :  { %2147 = vmatprep.subr.bf16.mxu1 %v2957_v24  ;;  %v3035_v24 = vld [vmem:[%s4077_s11 + $0x23c] ss:$28 sps:$4 sm:$0xff]  }
 0x3ac   :  { %v1241_v50 = vpop.f32.mrf.mxu1 }
 0x3ad   :  { %v1242_v52 = vadd.f32 %v2516_v49, %v1241_v50 }
 0x3ae   :  { %v2750_v51 = vpop.f32.mrf.mxu1 }
 0x3af   :  { %v1248_v56 = vmax.f32 %v1242_v52, 0.0 }
 0x3b0   :  { %v1244_v53 = vpop.f32.mrf.mxu1 }
 0x3b1   :  { %v1245_v54 = vadd.f32 %v2516_v49, %v1244_v53  ;;  %v3048_v53 = vld [vmem:[%s4077_s11 + $0x198] ss:$28 sps:$4 sm:$0xff]  }
 0x3b2   :  { %v2751_v55 = vpop.f32.mrf.mxu1 }
 0x3b3   :  { %v1249_v57 = vmax.f32 %v1245_v54, 0.0  ;;  %v3052_v54 = vld [vmem:[%s4077_s11 + $0x1a0] ss:$28 sps:$4 sm:$0xff]  }
 0x3b5   :  { %v1250_v60 = vpack.c.bf16 %v1249_v57, %v1248_v56  ;;  %v3055_v56 = vld [vmem:[%s4077_s11 + $0x164] ss:$28 sps:$4 sm:$0xff]  }
 0x3b6   :  { %v3056_v57 = vld [vmem:[%s4077_s11 + $0x328] ss:$28 sps:$4 sm:$0xff]  }
 0x3b7   :  { %2533 = vmatmul.mubr.msk.bf16.vlgmr.msra.gmra.mxu1 %vm1088_vm2, %v1250_v60  ;;  %v3057_v60 = vld [vmem:[%s4077_s11 + $0x168] ss:$28 sps:$4 sm:$0xff]  }
 0x3b8   :  { %2148 = vmatpush1.bf16.msra.mxu1 %v2955_v59  ;;  %v3053_v59 = vld [vmem:[%s4077_s11 + $0x160] ss:$28 sps:$4 sm:$0xff]  }
 0x3b9   :  { %2149 = vmatprep.subr.bf16.mxu1 %v2963_v62  ;;  %v3060_v62 = vld [vmem:[%s4077_s11 + $0x12c] ss:$28 sps:$4 sm:$0xff]  }
 0x3bc   :  { %2150 = vmatpush1.bf16.msra.mxu1 %v2961_v63  ;;  %v3061_v63 = vld [vmem:[%s4077_s11 + $0x2f0] ss:$28 sps:$4 sm:$0xff]  }
 0x3bd   :  { %2151 = vmatprep.subr.bf16.mxu1 %v2969_v1  ;;  %v3058_v1 = vld [vmem:[%s4077_s11 + $0x128] ss:$28 sps:$4 sm:$0xff]  }
 0x3c0   :  { %2152 = vmatpush1.bf16.msra.mxu1 %v2967_v3  ;;  %v3062_v3 = vld [vmem:[%s4077_s11 + $0x130] ss:$28 sps:$4 sm:$0xff]  }
 0x3c1   :  { %2153 = vmatprep.subr.bf16.mxu1 %v2975_v4  ;;  %v3065_v4 = vld [vmem:[%s4077_s11 + $0xf4] ss:$28 sps:$4 sm:$0xff]  }
 0x3c4   :  { %2154 = vmatpush1.bf16.msra.mxu1 %v2973_v5  ;;  %v3066_v5 = vld [vmem:[%s4077_s11 + $0x2b8] ss:$28 sps:$4 sm:$0xff]  }
 0x3c5   :  { %2155 = vmatprep.subr.bf16.mxu1 %v2981_v6  ;;  %v3063_v6 = vld [vmem:[%s4077_s11 + $0xf0] ss:$28 sps:$4 sm:$0xff]  }
 0x3c8   :  { %2156 = vmatpush1.bf16.msra.mxu1 %v2979_v7  ;;  %v3067_v7 = vld [vmem:[%s4077_s11 + $0xf8] ss:$28 sps:$4 sm:$0xff]  }
 0x3c9   :  { %2157 = vmatprep.subr.bf16.mxu1 %v2987_v8  ;;  %v3070_v8 = vld [vmem:[%s4077_s11 + $0xbc] ss:$28 sps:$4 sm:$0xff]  }
 0x3cc   :  { %2158 = vmatpush1.bf16.msra.mxu1 %v2985_v9  ;;  %v3071_v9 = vld [vmem:[%s4077_s11 + $0x280] ss:$28 sps:$4 sm:$0xff]  }
 0x3cd   :  { %2159 = vmatprep.subr.bf16.mxu1 %v2993_v10  ;;  %v3068_v10 = vld [vmem:[%s4077_s11 + $0xb8] ss:$28 sps:$4 sm:$0xff]  }
 0x3d0   :  { %2160 = vmatpush1.bf16.msra.mxu1 %v2991_v12  ;;  %v3072_v12 = vld [vmem:[%s4077_s11 + $0xc0] ss:$28 sps:$4 sm:$0xff]  }
 0x3d1   :  { %2161 = vmatprep.subr.bf16.mxu1 %v2999_v58  ;;  %v3075_v58 = vld [vmem:[%s4077_s11 + $0x84] ss:$28 sps:$4 sm:$0xff]  }
 0x3d4   :  { %2162 = vmatpush1.bf16.msra.mxu1 %v2997_v13  ;;  %v3076_v13 = vld [vmem:[%s4077_s11 + $0x248] ss:$28 sps:$4 sm:$0xff]  }
 0x3d5   :  { %2163 = vmatprep.subr.bf16.mxu1 %v3005_v14  ;;  %v3073_v14 = vld [vmem:[%s4077_s11 + $0x80] ss:$28 sps:$4 sm:$0xff]  }
 0x3d8   :  { %2164 = vmatpush2.bf16.msra.mxu1 %v3003_v15  ;;  %v3077_v15 = vld [vmem:[%s4077_s11 + $0x88] ss:$28 sps:$4 sm:$0xff]  }
 0x3d9   :  { %2165 = vmatprep.subr.bf16.mxu1 %v3011_v16  ;;  %v3080_v16 = vld [vmem:[%s4077_s11 + $0x4c] ss:$28 sps:$4 sm:$0xff]  }
 0x3dc   :  { %2166 = vmatpush2.bf16.msra.mxu1 %v3009_v17  ;;  %v3081_v17 = vld [vmem:[%s4077_s11 + $0x210] ss:$28 sps:$4 sm:$0xff]  }
 0x3dd   :  { %2167 = vmatprep.subr.bf16.mxu1 %v3017_v18  ;;  %v3078_v18 = vld [vmem:[%s4077_s11 + $0x48] ss:$28 sps:$4 sm:$0xff]  }
 0x3e0   :  { %2168 = vmatpush2.bf16.msra.mxu1 %v3015_v19  ;;  %v3082_v19 = vld [vmem:[%s4077_s11 + $0x50] ss:$28 sps:$4 sm:$0xff]  }
 0x3e1   :  { %2169 = vmatprep.subr.bf16.mxu1 %v3023_v20  ;;  %v3085_v20 = vld [vmem:[%s4077_s11 + $0x14] ss:$28 sps:$4 sm:$0xff]  }
 0x3e4   :  { %2170 = vmatpush2.bf16.msra.mxu1 %v3021_v21  ;;  %v3086_v21 = vld [vmem:[%s4077_s11 + $0x1d8] ss:$28 sps:$4 sm:$0xff]  }
 0x3e5   :  { %2171 = vmatprep.subr.bf16.mxu1 %v3029_v11  ;;  %v3083_v11 = vld [vmem:[%s4077_s11 + $0x10] ss:$28 sps:$4 sm:$0xff]  }
 0x3e8   :  { %2172 = vmatpush2.bf16.msra.mxu1 %v3027_v22  ;;  %v3087_v22 = vld [vmem:[%s4077_s11 + $0x18] ss:$28 sps:$4 sm:$0xff]  }
 0x3e9   :  { %2173 = vmatprep.subr.bf16.mxu1 %v3035_v24  ;;  %v3088_v24 = vld [vmem:[%s4077_s11 + $0x358] ss:$28 sps:$4 sm:$0xff]  }
 0x3ec   :  { %2174 = vmatpush2.bf16.msra.mxu1 %v3033_v26  ;;  %v3091_v26 = vld [vmem:[%s4077_s11 + $0x320] ss:$28 sps:$4 sm:$0xff]  }
 0x3ed   :  { %2175 = vmatprep.subr.bf16.mxu1 %v3041_v28  ;;  %v3094_v28 = vld [vmem:[%s4077_s11 + $0x2e8] ss:$28 sps:$4 sm:$0xff]  }
 0x3f0   :  { %2176 = vmatpush2.bf16.msra.mxu1 %v3039_v30  ;;  %v3097_v30 = vld [vmem:[%s4077_s11 + $0x2b0] ss:$28 sps:$4 sm:$0xff]  }
 0x3f1   :  { %2177 = vmatprep.subr.bf16.mxu1 %v3047_v32  ;;  %v3100_v32 = vld [vmem:[%s4077_s11 + $0x278] ss:$28 sps:$4 sm:$0xff]  }
 0x3f4   :  { %2178 = vmatpush2.bf16.msra.mxu1 %v3045_v34  ;;  %v3103_v34 = vld [vmem:[%s4077_s11 + $0x240] ss:$28 sps:$4 sm:$0xff]  }
 0x3f5   :  { %2698 = vmatprep.subr.bf16.mxu1 %v3051_v36  ;;  %v3106_v36 = vld [vmem:[%s4077_s11 + $0x208] ss:$28 sps:$4 sm:$0xff]  }
 0x477   :  { %v1348_v38 = vpop.f32.mrf.mxu1 }
 0x478   :  { %v1349_v45 = vadd.f32 %v1348_v38, %v1264_v40  ;;  %v3109_v38 = vld [vmem:[%s4077_s11 + $0x1d0] ss:$28 sps:$4 sm:$0xff]  }
 0x479   :  { %v1350_v41 = vpop.f32.mrf.mxu1 }
 0x47a   :  { %v1351_v43 = vadd.f32 %v1350_v41, %v1268_v39  ;;  %v1357_v51 = vmax.f32 %v1349_v45, 0.0  ;;  %v1507_v41 = vsub.s32 3, %v3578_v61 }
 0x47b   :  { %v1352_v42 = vpop.f32.mrf.mxu1 }
 0x47c   :  { %v1353_v44 = vadd.f32 %v1352_v42, %v1264_v40  ;;  %v1358_v49 = vmax.f32 %v1351_v43, 0.0  ;;  %v4029_v40 = vld [vmem:[%s4080_s12] sm:$0x7f] }
 0x47d   :  { %v1354_v46 = vpop.f32.mrf.mxu1  ;;  %v1496_v42 = vrot.slane %v4029_v40, %v3587_v2  ;;  %v1508_v45 = vrot.slane %v4029_v40, %v1507_v41 }
 0x47e   :  { %v1355_v47 = vadd.f32 %v1354_v46, %v1268_v39  ;;  %v1359_v48 = vmax.f32 %v1353_v44, 0.0  ;;  %v1503_v39 = vsub.s32 2, %v3578_v61  ;;  %v1500_v44 = vrot.slane %v4029_v40, %v3581_v0 }
 0x480   :  { %v1360_v50 = vmax.f32 %v1355_v47, 0.0  ;;  %v3887_v55 = vpack.c.bf16 %v1359_v48, %v1357_v51  ;;  %v1504_v43 = vrot.slane %v4029_v40, %v1503_v39 }
 0x482   :  { %v1362_v52 = vpack.c.bf16 %v1360_v50, %v1358_v49 }
 0x484   :  { %2136 = vmatprep.mubr.bf16.mxu0 %v1362_v52  ;;  %2179 = vmatprep.mubr.bf16.mxu1 %v1362_v52 }
 0x485   :  { %2137 = vmatmul.mubr.bf16.vlgmr.msra.gmra.mxu0 %v3887_v55  ;;  %2180 = vmatmul.mubr.bf16.vlgmr.msra.gmra.mxu1 %v3887_v55 }
 0x486   :  { %2191 = vmatpush1.bf16.msra.mxu0 %v3048_v53  ;;  %2699 = vmatpush3.bf16.msra.mxu1 %v3052_v54 }
 0x487   :  { %2222 = vmatprep.mubr.bf16.mxu0 %v1362_v52  ;;  %2265 = vmatprep.mubr.bf16.mxu1 %v1362_v52 }
 0x488   :  { %2192 = vmatprep.subr.bf16.mxu0 %v3055_v56  ;;  %2700 = vmatprep.subr.bf16.mxu1 %v3056_v57 }
 0x48a   :  { %2193 = vmatpush1.bf16.msra.mxu0 %v3053_v59  ;;  %2701 = vmatpush3.bf16.msra.mxu1 %v3057_v60 }
 0x48b   :  { %2194 = vmatprep.subr.bf16.mxu0 %v3060_v62  ;;  %2702 = vmatprep.subr.bf16.mxu1 %v3061_v63 }
 0x48e   :  { %2195 = vmatpush1.bf16.msra.mxu0 %v3058_v1  ;;  %2703 = vmatpush3.bf16.msra.mxu1 %v3062_v3 }
 0x48f   :  { %2196 = vmatprep.subr.bf16.mxu0 %v3065_v4  ;;  %2704 = vmatprep.subr.bf16.mxu1 %v3066_v5 }
 0x492   :  { %2197 = vmatpush1.bf16.msra.mxu0 %v3063_v6  ;;  %2705 = vmatpush3.bf16.msra.mxu1 %v3067_v7 }
 0x493   :  { %2198 = vmatprep.subr.bf16.mxu0 %v3070_v8  ;;  %2706 = vmatprep.subr.bf16.mxu1 %v3071_v9 }
 0x496   :  { %2199 = vmatpush1.bf16.msra.mxu0 %v3068_v10  ;;  %2707 = vmatpush3.bf16.msra.mxu1 %v3072_v12 }
 0x497   :  { %2200 = vmatprep.subr.bf16.mxu0 %v3075_v58  ;;  %2708 = vmatprep.subr.bf16.mxu1 %v3076_v13 }
 0x49a   :  { %2201 = vmatpush1.bf16.msra.mxu0 %v3073_v14  ;;  %2709 = vmatpush3.bf16.msra.mxu1 %v3077_v15 }
 0x49b   :  { %2202 = vmatprep.subr.bf16.mxu0 %v3080_v16  ;;  %2710 = vmatprep.subr.bf16.mxu1 %v3081_v17 }
 0x49e   :  { %2203 = vmatpush1.bf16.msra.mxu0 %v3078_v18  ;;  %2711 = vmatpush3.bf16.msra.mxu1 %v3082_v19 }
 0x49f   :  { %2204 = vmatprep.subr.bf16.mxu0 %v3085_v20  ;;  %2712 = vmatprep.subr.bf16.mxu1 %v3086_v21 }
 0x4a2   :  { %2205 = vmatpush1.bf16.msra.mxu0 %v3083_v11  ;;  %2713 = vmatpush3.bf16.msra.mxu1 %v3087_v22 }
 0x4a3   :  { %2206 = vmatprep.subr.bf16.mxu0 %v3090_v23 }
 0x4a5   :  { %2266 = vmatmul.mubr.bf16.vlgmr.msra.gmra.mxu1 %v3887_v55 }
 0x4a6   :  { %2207 = vmatpush2.bf16.msra.mxu0 %v3088_v24 }
 0x4a7   :  { %2208 = vmatprep.subr.bf16.mxu0 %v3093_v25 }
 0x4aa   :  { %2209 = vmatpush2.bf16.msra.mxu0 %v3091_v26 }
 0x4ab   :  { %2210 = vmatprep.subr.bf16.mxu0 %v3096_v27 }
 0x4ae   :  { %2211 = vmatpush2.bf16.msra.mxu0 %v3094_v28 }
 0x4af   :  { %2212 = vmatprep.subr.bf16.mxu0 %v3099_v29 }
 0x4b2   :  { %2213 = vmatpush2.bf16.msra.mxu0 %v3097_v30 }
 0x4b3   :  { %2214 = vmatprep.subr.bf16.mxu0 %v3102_v31 }
 0x4b6   :  { %2215 = vmatpush2.bf16.msra.mxu0 %v3100_v32 }
 0x4b7   :  { %2216 = vmatprep.subr.bf16.mxu0 %v3105_v33 }
 0x4ba   :  { %2217 = vmatpush2.bf16.msra.mxu0 %v3103_v34  ;;  %v1519_v34 = vsub.s32 6, %v3578_v61 }
 0x4bb   :  { %2218 = vmatprep.subr.bf16.mxu0 %v3108_v35 }
 0x4be   :  { %2219 = vmatpush2.bf16.msra.mxu0 %v3106_v36 }
 0x4bf   :  { %2220 = vmatprep.subr.bf16.mxu0 %v3111_v37  ;;  %v1520_v37 = vrot.slane %v4029_v40, %v1519_v34 }
 0x4c2   :  { %2221 = vmatpush2.bf16.msra.mxu0 %v3109_v38 }
 0x4c5   :  { %2223 = vmatmul.mubr.bf16.vlgmr.msra.gmra.mxu0 %v3887_v55 }
 0x545   :  { %v2138_v46 = vpop.f32.mrf.mxu0  ;;  %v2181_v47 = vpop.f32.mrf.mxu1 }
 0x546   :  { %v2139_v48 = vadd.f32 %v2138_v46, %v1496_v42  ;;  %v2182_v49 = vadd.f32 %v2181_v47, %v1504_v43 }
 0x547   :  { %v2140_v50 = vpop.f32.mrf.mxu0  ;;  %v2183_v51 = vpop.f32.mrf.mxu1 }
 0x548   :  { %v2274_v52 = vmul.f32 0.5, %v2139_v48  ;;  %v2276_v53 = vmul.f32 0.5, %v2182_v49  ;;  %v2141_v54 = vadd.f32 %v2140_v50, %v1500_v44  ;;  %v2184_v55 = vadd.f32 %v2183_v51, %v1508_v45 }
 0x549   :  { %v2142_v56 = vpop.f32.mrf.mxu0  ;;  %v2185_v57 = vpop.f32.mrf.mxu1  ;;  %v1511_v51 = vsub.s32 4, %v3578_v61 }
 0x54a   :  { %3112 = vtanh.f32 %v2274_v52  ;;  %v2275_v2 = vmul.f32 0.5, %v2141_v54  ;;  %v2277_v59 = vmul.f32 0.5, %v2184_v55  ;;  %v2143_v60 = vadd.f32 %v2142_v56, %v1496_v42 }
 0x54b   :  { %3114 = vtanh.f32 %v2276_v53  ;;  %v2186_v0 = vadd.f32 %v2185_v57, %v1504_v43  ;;  %v2144_v62 = vpop.f32.mrf.mxu0  ;;  %v2187_v63 = vpop.f32.mrf.mxu1  ;;  %v1515_v55 = vsub.s32 5, %v3578_v61  ;;  %v1512_v57 = vrot.slane %v4029_v40, %v1511_v51 }
 0x54c   :  { %3116 = vtanh.f32 %v2275_v2  ;;  %v2281_v1 = vmul.f32 0.5, %v2143_v60  ;;  %v2145_v3 = vadd.f32 %v2144_v62, %v1500_v44  ;;  %v2188_v4 = vadd.f32 %v2187_v63, %v1508_v45 }
 0x54d   :  { %3118 = vtanh.f32 %v2277_v59  ;;  %v2283_v5 = vmul.f32 0.5, %v2186_v0  ;;  %v1516_v59 = vrot.slane %v4029_v40, %v1515_v55 }
 0x54e   :  { %3120 = vtanh.f32 %v2281_v1  ;;  %v2282_v6 = vmul.f32 0.5, %v2145_v3  ;;  %v2284_v7 = vmul.f32 0.5, %v2188_v4 }
 0x54f   :  { %3122 = vtanh.f32 %v2283_v5 }
 0x550   :  { %3124 = vtanh.f32 %v2282_v6 }
 0x551   :  { %3126 = vtanh.f32 %v2284_v7 }
 0x557   :  { %v3113_v8 = vpop.eup %3112 }
 0x558   :  { %v3115_v9 = vpop.eup %3114  ;;  %v2302_v10 = vmul.f32 0.5, %v3113_v8 }
 0x559   :  { %v3117_v12 = vpop.eup %3116  ;;  %v2304_v58 = vmul.f32 0.5, %v3115_v9 }
 0x55a   :  { %v3119_v13 = vpop.eup %3118  ;;  %v2303_v14 = vmul.f32 0.5, %v3117_v12  ;;  %v2316_v18 = vadd.f32 0.5, %v2302_v10 }
 0x55b   :  { %v3121_v15 = vpop.eup %3120  ;;  %v2305_v16 = vmul.f32 0.5, %v3119_v13  ;;  %v2318_v11 = vadd.f32 0.5, %v2304_v58 }
 0x55c   :  { %v3123_v17 = vpop.eup %3122  ;;  %v2317_v19 = vadd.f32 0.5, %v2303_v14  ;;  %v2309_v20 = vmul.f32 0.5, %v3121_v15 }
 0x55d   :  { %v3125_v21 = vpop.eup %3124  ;;  %v2319_v22 = vadd.f32 0.5, %v2305_v16  ;;  %v2311_v23 = vmul.f32 0.5, %v3123_v17 }
 0x55e   :  { %v3127_v24 = vpop.eup %3126  ;;  %v2654_v25 = vpack.c.bf16 %v2317_v19, %v2316_v18  ;;  %v2310_v26 = vmul.f32 0.5, %v3125_v21  ;;  %v2323_v29 = vadd.f32 0.5, %v2309_v20 }
 0x55f   :  { %v2655_v27 = vpack.c.bf16 %v2319_v22, %v2318_v11  ;;  %v2312_v28 = vmul.f32 0.5, %v3127_v24  ;;  %v2325_v31 = vadd.f32 0.5, %v2311_v23 }
 0x560   :  { %2374 = vst [vmem:[%s4081_s13] sm:$0xff] %v2654_v25  ;;  %v2324_v30 = vadd.f32 0.5, %v2310_v26 }
 0x561   :  { %2375 = vst [vmem:[%s4081_s13 + $0x8] sm:$0xff] %v2655_v27  ;;  %v2326_v32 = vadd.f32 0.5, %v2312_v28 }
 0x562   :  { %v2658_v33 = vpack.c.bf16 %v2324_v30, %v2323_v29 }
 0x563   :  { %v2659_v35 = vpack.c.bf16 %v2326_v32, %v2325_v31 }
 0x564   :  { %2379 = vst [vmem:[%s4081_s13 + $0x1c] sm:$0xff] %v2658_v33 }
 0x565   :  { %2380 = vst [vmem:[%s4081_s13 + $0x24] sm:$0xff] %v2659_v35  ;;  %v2714_v36 = vpop.f32.mrf.mxu1 }
 0x567   :  { %v2715_v38 = vpop.f32.mrf.mxu1 }
 0x568   :  { %v2716_v39 = vadd.f32 %v2715_v38, %v2714_v36 }
 0x569   :  { %v2717_v41 = vpop.f32.mrf.mxu1 }
 0x56a   :  { %v2268_v42 = vadd.f32 %v2716_v39, %v1520_v37 }
 0x56b   :  { %v2718_v43 = vpop.f32.mrf.mxu1 }
 0x56c   :  { %v2280_v44 = vmul.f32 0.5, %v2268_v42  ;;  %v2719_v45 = vadd.f32 %v2718_v43, %v2717_v41 }
 0x56e   :  { %3128 = vtanh.f32 %v2280_v44  ;;  %v2271_v46 = vadd.f32 %v2719_v45, %v1520_v37 }
 0x570   :  { %v2287_v47 = vmul.f32 0.5, %v2271_v46 }
 0x572   :  { %3130 = vtanh.f32 %v2287_v47 }
 0x57b   :  { %v3129_v48 = vpop.eup %3128 }
 0x57c   :  { %v2308_v49 = vmul.f32 0.5, %v3129_v48 }
 0x57e   :  { %v2322_v50 = vadd.f32 0.5, %v2308_v49 }
 0x57f   :  { %v3131_v52 = vpop.eup %3130 }
 0x580   :  { %v2657_v53 = vpack.c.bf16 %v2322_v50, %v2322_v50  ;;  %v2315_v54 = vmul.f32 0.5, %v3131_v52 }
 0x582   :  { %2378 = vst.msk [vmem:[%s4081_s13 + $0x18] sm:$0xf] %vm2377_vm3, %v2657_v53  ;;  %v2329_v56 = vadd.f32 0.5, %v2315_v54 }
 0x584   :  { %v2661_v2 = vpack.c.bf16 %v2329_v56, %v2329_v56 }
 0x585   :  { %v2224_v60 = vpop.f32.mrf.mxu0 }
 0x586   :  { %2382 = vst.msk [vmem:[%s4081_s13 + $0x34] sm:$0xf] %vm2377_vm3, %v2661_v2  ;;  %v2225_v0 = vadd.f32 %v2224_v60, %v1512_v57 }
 0x587   :  { %v2226_v62 = vpop.f32.mrf.mxu0 }
 0x588   :  { %v2278_v63 = vmul.f32 0.5, %v2225_v0  ;;  %v2227_v1 = vadd.f32 %v2226_v62, %v1516_v59 }
 0x589   :  { %v2228_v61 = vpop.f32.mrf.mxu0 }
 0x58a   :  { %3132 = vtanh.f32 %v2278_v63  ;;  %v2279_v3 = vmul.f32 0.5, %v2227_v1  ;;  %v2229_v4 = vadd.f32 %v2228_v61, %v1512_v57 }
 0x58b   :  { %v2230_v5 = vpop.f32.mrf.mxu0 }
 0x58c   :  { %3134 = vtanh.f32 %v2279_v3  ;;  %v2285_v6 = vmul.f32 0.5, %v2229_v4  ;;  %v2231_v7 = vadd.f32 %v2230_v5, %v1516_v59 }
 0x58e   :  { %3136 = vtanh.f32 %v2285_v6  ;;  %v2286_v8 = vmul.f32 0.5, %v2231_v7 }
 0x590   :  { %3138 = vtanh.f32 %v2286_v8 }
 0x597   :  { %v3133_v40 = vpop.eup %3132 }
 0x598   :  { %v2306_v9 = vmul.f32 0.5, %v3133_v40 }
 0x599   :  { %v3135_v10 = vpop.eup %3134 }
 0x59a   :  { %v2307_v12 = vmul.f32 0.5, %v3135_v10  ;;  %v2320_v13 = vadd.f32 0.5, %v2306_v9 }
 0x59b   :  { %v3137_v58 = vpop.eup %3136 }
 0x59c   :  { %v2321_v14 = vadd.f32 0.5, %v2307_v12  ;;  %v2313_v15 = vmul.f32 0.5, %v3137_v58 }
 0x59d   :  { %v3139_v16 = vpop.eup %3138 }
 0x59e   :  { %v2656_v17 = vpack.c.bf16 %v2321_v14, %v2320_v13  ;;  %v2314_v18 = vmul.f32 0.5, %v3139_v16  ;;  %v2327_v19 = vadd.f32 0.5, %v2313_v15 }
 0x5a0   :  { %2376 = vst [vmem:[%s4081_s13 + $0x10] sm:$0xff] %v2656_v17  ;;  %v2328_v20 = vadd.f32 0.5, %v2314_v18 }
 0x5a2   :  { %v2660_v21 = vpack.c.bf16 %v2328_v20, %v2327_v19 }
 0x5a4   :  { %2381 = vst [vmem:[%s4081_s13 + $0x2c] sm:$0xff] %v2660_v21 }

</bundles_post_ra>
